<compile_context>
chip_gen: v7x
topology: tpu7x:2x2x1
jax: 0.10.0
libtpu: 0.0.40
codegen_flags: <defaults>
</compile_context>

<pallas_src>
import math

import jax
import jax.numpy as jnp
from jax.experimental import pallas as pl
from jax.experimental.pallas import tpu as pltpu

# ---------------- synthetic tiny-BERT config ----------------
VOCAB_SIZE = 100
HIDDEN = 32
NUM_LAYERS = 2
NUM_HEADS = 2
HEAD_DIM = HIDDEN // NUM_HEADS
INTERMEDIATE = 64
MAX_POS = 64
TYPE_VOCAB = 2
PAD_ID = 0
LN_EPS = 1e-12
LAYERS = [-1]          # BertWordPieceEncoder(layers='-1') -> last encoder layer

# ---------------- lane-padded layout constants ----------------
LANE = 128
HP = ((HIDDEN + LANE - 1) // LANE) * LANE          # padded hidden       (128)
IP = ((INTERMEDIATE + LANE - 1) // LANE) * LANE    # padded intermediate (128)
N3 = 3 * LANE                                      # Q|K|V, one 128-lane block each
ATTN_SCALE = 1.0 / math.sqrt(HEAD_DIM)


# ---------------- fused encoder kernel ----------------
def _bert_encoder_kernel(x_emb_ref, bias_ref, eg_ref, eb_ref,
                         qkv_w_ref, qkv_b_ref, o_w_ref, o_b_ref,
                         ln1_g_ref, ln1_b_ref,
                         i_w_ref, i_b_ref, f_w_ref, f_b_ref,
                         ln2_g_ref, ln2_b_ref,
                         out_ref):
    """Grid = (layer,).  out_ref (B*S, HP) is the VMEM-resident hidden-state
    carry across the (arbitrary) layer axis; HBM writeback happens once.

    All activations keep lanes [HIDDEN:HP] exactly zero (weights / gammas /
    betas are zero-padded), so matmuls and residual adds are correct on the
    padded lanes and LayerNorm sums over HP equal sums over HIDDEN.
    """
    l = pl.program_id(0)
    B = bias_ref.shape[0]
    S = bias_ref.shape[2]

    lane = jax.lax.broadcasted_iota(jnp.int32, (1, HP), 1)
    lane_mask = lane < HIDDEN
    inv_h = 1.0 / HIDDEN

    def layernorm(y, g, b):
        mean = jnp.sum(y, axis=-1, keepdims=True) * inv_h
        yc = jnp.where(lane_mask, y - mean, 0.0)
        var = jnp.sum(yc * yc, axis=-1, keepdims=True) * inv_h
        return yc * jax.lax.rsqrt(var + LN_EPS) * g + b

    # Embedding LayerNorm seeds the carry on the first layer step only.
    @pl.when(l == 0)
    def _():
        out_ref[...] = layernorm(x_emb_ref[...], eg_ref[...], eb_ref[...])

    x = out_ref[...]                                          # (B*S, HP) f32

    # ---- fused QKV projection: (B*S, HP) @ (HP, 3*128) ----
    qkv = jnp.dot(x.astype(jnp.bfloat16), qkv_w_ref[0],
                  preferred_element_type=jnp.float32) + qkv_b_ref[0]
    q_all = qkv[:, 0:LANE]                                    # heads at lanes [h*HD:(h+1)*HD]
    k_all = qkv[:, LANE:2 * LANE].astype(jnp.bfloat16)
    v_all = qkv[:, 2 * LANE:3 * LANE].astype(jnp.bfloat16)

    # ---- per-sequence attention (static unroll over tiny B and H) ----
    ctx_rows = []
    for b in range(B):
        q_b = q_all[b * S:(b + 1) * S, :]                     # (S, 128)
        k_b = k_all[b * S:(b + 1) * S, :]
        v_b = v_all[b * S:(b + 1) * S, :]
        bias_b = bias_ref[b]                                  # (1, S) additive pad bias
        ctx_b = jnp.zeros((S, HP), jnp.float32)
        for h in range(NUM_HEADS):
            h_mask = (lane >= h * HEAD_DIM) & (lane < (h + 1) * HEAD_DIM)
            # Mask Q to head-h lanes; K shares those lanes, so the lane
            # contraction yields exactly head h's scores (no lane slicing).
            q_h = jnp.where(h_mask, q_b, 0.0).astype(jnp.bfloat16)
            s = jax.lax.dot_general(q_h, k_b, (((1,), (1,)), ((), ())),
                                    preferred_element_type=jnp.float32)
            s = s * ATTN_SCALE + bias_b                       # (S, S)
            s = s - jnp.max(s, axis=-1, keepdims=True)
            p = jnp.exp(s)
            p = p * pl.reciprocal(jnp.sum(p, axis=-1, keepdims=True), approx=True)
            c = jnp.dot(p.astype(jnp.bfloat16), v_b,
                        preferred_element_type=jnp.float32)   # (S, 128)
            ctx_b = ctx_b + jnp.where(h_mask, c, 0.0)         # keep only head-h lanes
        ctx_rows.append(ctx_b)
    ctx = jnp.concatenate(ctx_rows, axis=0)                   # (B*S, HP), lane-dense

    # ---- attention output projection + residual + LN ----
    attn = jnp.dot(ctx.astype(jnp.bfloat16), o_w_ref[0],
                   preferred_element_type=jnp.float32) + o_b_ref[0]
    x = layernorm(attn + x, ln1_g_ref[0], ln1_b_ref[0])

    # ---- FFN + residual + LN ----
    inter = jnp.dot(x.astype(jnp.bfloat16), i_w_ref[0],
                    preferred_element_type=jnp.float32) + i_b_ref[0]
    # TODO(synk): HF/fastNLP BERT uses exact erf-GELU; tanh approximation is
    # used here because it lowers cleanly to the EUP.
    inter = jax.nn.gelu(inter, approximate=True)
    ffn = jnp.dot(inter.astype(jnp.bfloat16), f_w_ref[0],
                  preferred_element_type=jnp.float32) + f_b_ref[0]
    out_ref[...] = layernorm(ffn + x, ln2_g_ref[0], ln2_b_ref[0])   # carry / final


def _run_encoder(packed, x_emb, attn_bias):
    """x_emb: (B*S, HP) f32 (lanes >= HIDDEN zero); attn_bias: (B, 1, S) f32."""
    BS, _ = x_emb.shape
    B = attn_bias.shape[0]
    S = attn_bias.shape[2]

    wspec = lambda shape: pl.BlockSpec((1,) + shape, lambda l: (l, 0, 0))

    return pl.pallas_call(
        _bert_encoder_kernel,
        out_shape=jax.ShapeDtypeStruct((BS, HP), jnp.float32),
        grid_spec=pltpu.PrefetchScalarGridSpec(
            num_scalar_prefetch=0,
            grid=(NUM_LAYERS,),
            in_specs=[
                pl.BlockSpec((BS, HP), lambda l: (0, 0)),        # x_emb (layer-invariant)
                pl.BlockSpec((B, 1, S), lambda l: (0, 0, 0)),    # additive pad bias
                pl.BlockSpec((1, HP), lambda l: (0, 0)),         # emb_ln_g
                pl.BlockSpec((1, HP), lambda l: (0, 0)),         # emb_ln_b
                wspec((HP, N3)),                                 # qkv_w   (bf16)
                wspec((1, N3)),                                  # qkv_b
                wspec((HP, HP)),                                 # o_w     (bf16)
                wspec((1, HP)),                                  # o_b
                wspec((1, HP)), wspec((1, HP)),                  # ln1_g / ln1_b
                wspec((HP, IP)), wspec((1, IP)),                 # i_w (bf16), i_b
                wspec((IP, HP)), wspec((1, HP)),                 # f_w (bf16), f_b
                wspec((1, HP)), wspec((1, HP)),                  # ln2_g / ln2_b
            ],
            # Layer-invariant output block index => hidden state stays resident
            # in VMEM across the layer axis, one HBM writeback at the end.
            out_specs=pl.BlockSpec((BS, HP), lambda l: (0, 0)),
        ),
        compiler_params=pltpu.CompilerParams(
            dimension_semantics=("arbitrary",)),
    )(x_emb, attn_bias,
      packed['emb_ln_g'], packed['emb_ln_b'],
      packed['qkv_w'], packed['qkv_b'], packed['o_w'], packed['o_b'],
      packed['ln1_g'], packed['ln1_b'],
      packed['i_w'], packed['i_b'], packed['f_w'], packed['f_b'],
      packed['ln2_g'], packed['ln2_b'])


# ---------------- parameters (deterministic, synthetic) ----------------
def init_params(key):
    keys = jax.random.split(key, 4 + NUM_LAYERS)

    def nrm(k, shape):
        return (0.02 * jax.random.normal(k, shape)).astype(jnp.float32)

    params = {
        'word_emb': nrm(keys[0], (VOCAB_SIZE, HIDDEN)),
        'pos_emb': nrm(keys[1], (MAX_POS, HIDDEN)),
        'type_emb': nrm(keys[2], (TYPE_VOCAB, HIDDEN)),
        'emb_ln_g': jnp.ones((HIDDEN,), jnp.float32),
        'emb_ln_b': jnp.zeros((HIDDEN,), jnp.float32),
        'layers': [],
    }
    for l in range(NUM_LAYERS):
        lk = jax.random.split(keys[4 + l], 6)
        params['layers'].append({
            'q_w': nrm(lk[0], (HIDDEN, HIDDEN)), 'q_b': jnp.zeros((HIDDEN,), jnp.float32),
            'k_w': nrm(lk[1], (HIDDEN, HIDDEN)), 'k_b': jnp.zeros((HIDDEN,), jnp.float32),
            'v_w': nrm(lk[2], (HIDDEN, HIDDEN)), 'v_b': jnp.zeros((HIDDEN,), jnp.float32),
            'o_w': nrm(lk[3], (HIDDEN, HIDDEN)), 'o_b': jnp.zeros((HIDDEN,), jnp.float32),
            'ln1_g': jnp.ones((HIDDEN,), jnp.float32), 'ln1_b': jnp.zeros((HIDDEN,), jnp.float32),
            'i_w': nrm(lk[4], (HIDDEN, INTERMEDIATE)), 'i_b': jnp.zeros((INTERMEDIATE,), jnp.float32),
            'f_w': nrm(lk[5], (INTERMEDIATE, HIDDEN)), 'f_b': jnp.zeros((HIDDEN,), jnp.float32),
            'ln2_g': jnp.ones((HIDDEN,), jnp.float32), 'ln2_b': jnp.zeros((HIDDEN,), jnp.float32),
        })
    return params


def pack_params(params):
    """One-time host-side prep: fuse QKV (Q | K | V each in its own 128-lane
    block, heads at their natural lane offsets), stack per-layer weights along
    a leading layer axis, zero-pad to lane-dense shapes, and cast matmul
    weights to bf16 (MXU-native).  Biases / LN params stay f32."""
    def padded(mat, rows, cols):
        out = jnp.zeros((rows, cols), jnp.float32)
        return out.at[:mat.shape[0], :mat.shape[1]].set(mat)

    qkv_w, qkv_b, o_w, o_b = [], [], [], []
    ln1_g, ln1_b, i_w, i_b, f_w, f_b, ln2_g, ln2_b = ([] for _ in range(8))

    for lp in params['layers']:
        qw = jnp.zeros((HP, N3), jnp.float32)
        qw = qw.at[:HIDDEN, 0:HIDDEN].set(lp['q_w'])
        qw = qw.at[:HIDDEN, LANE:LANE + HIDDEN].set(lp['k_w'])
        qw = qw.at[:HIDDEN, 2 * LANE:2 * LANE + HIDDEN].set(lp['v_w'])
        qkv_w.append(qw)

        qb = jnp.zeros((1, N3), jnp.float32)
        qb = qb.at[0, 0:HIDDEN].set(lp['q_b'])
        qb = qb.at[0, LANE:LANE + HIDDEN].set(lp['k_b'])
        qb = qb.at[0, 2 * LANE:2 * LANE + HIDDEN].set(lp['v_b'])
        qkv_b.append(qb)

        o_w.append(padded(lp['o_w'], HP, HP))
        o_b.append(padded(lp['o_b'][None, :], 1, HP))
        ln1_g.append(padded(lp['ln1_g'][None, :], 1, HP))
        ln1_b.append(padded(lp['ln1_b'][None, :], 1, HP))
        i_w.append(padded(lp['i_w'], HP, IP))
        i_b.append(padded(lp['i_b'][None, :], 1, IP))
        f_w.append(padded(lp['f_w'], IP, HP))
        f_b.append(padded(lp['f_b'][None, :], 1, HP))
        ln2_g.append(padded(lp['ln2_g'][None, :], 1, HP))
        ln2_b.append(padded(lp['ln2_b'][None, :], 1, HP))

    stack = lambda xs: jnp.stack(xs, axis=0)
    return {
        'word_emb': params['word_emb'], 'pos_emb': params['pos_emb'],
        'type_emb': params['type_emb'],
        'emb_ln_g': padded(params['emb_ln_g'][None, :], 1, HP),
        'emb_ln_b': padded(params['emb_ln_b'][None, :], 1, HP),
        'qkv_w': stack(qkv_w).astype(jnp.bfloat16), 'qkv_b': stack(qkv_b),
        'o_w': stack(o_w).astype(jnp.bfloat16), 'o_b': stack(o_b),
        'ln1_g': stack(ln1_g), 'ln1_b': stack(ln1_b),
        'i_w': stack(i_w).astype(jnp.bfloat16), 'i_b': stack(i_b),
        'f_w': stack(f_w).astype(jnp.bfloat16), 'f_b': stack(f_b),
        'ln2_g': stack(ln2_g), 'ln2_b': stack(ln2_b),
    }


# ---------------- forward (BertWordPieceEncoder.forward semantics) ----------------
def bert_wordpiece_encoder_forward(packed, word_pieces, token_type_ids=None):
    B, S = word_pieces.shape
    if token_type_ids is None:
        token_type_ids = jnp.zeros_like(word_pieces)

    # Embedding table lookups are glue (gather in plain JAX).
    emb = (jnp.take(packed['word_emb'], word_pieces, axis=0)
           + packed['pos_emb'][None, :S, :]
           + jnp.take(packed['type_emb'], token_type_ids, axis=0)).astype(jnp.float32)
    # lane-dense, batch folded into the matmul M dimension: (B*S, 128)
    x_emb = jnp.pad(emb, ((0, 0), (0, 0), (0, HP - HIDDEN))).reshape(B * S, HP)

    # attention_mask = word_pieces.ne(pad) -> additive bias, computed once here
    # (layer-invariant) instead of per layer step inside the kernel.
    attn_bias = jnp.where(word_pieces == PAD_ID, -10000.0, 0.0).astype(jnp.float32)
    attn_bias = attn_bias.reshape(B, 1, S)

    hidden_last = _run_encoder(packed, x_emb, attn_bias)         # (B*S, HP)
    hidden_last = hidden_last.reshape(B, S, HP)[:, :, :HIDDEN]

    # forward(): outputs = torch.cat([*outputs], dim=-1).  layers='-1' selects
    # only the last encoder layer, which is exactly what the kernel emits.
    assert LAYERS == [-1]
    return jnp.concatenate([hidden_last for _ in LAYERS], axis=-1)


if __name__ == "__main__":
    key = jax.random.PRNGKey(0)
    pkey, dkey = jax.random.split(key)
    packed = pack_params(init_params(pkey))

    B, S = 2, 8
    word_pieces = jax.random.randint(dkey, (B, S), 1, VOCAB_SIZE, dtype=jnp.int32)
    # pad the tail of the second sequence to exercise the attention mask
    word_pieces = word_pieces.at[1, 6:].set(PAD_ID)

    forward = jax.jit(bert_wordpiece_encoder_forward)
    out = forward(packed, word_pieces)
    out = jax.block_until_ready(out)
    assert out.shape == (B, S, HIDDEN * len(LAYERS)), out.shape
    assert out.dtype == jnp.float32
    print("KERNEL_OK")
</pallas_src>

<mosaic_0001>
module attributes {stable_mosaic.version = 11 : i64} {
  func.func @_bert_encoder_kernel(%arg0: i32, %arg1: memref<16x128xf32, #tpu.memory_space<vmem>>, %arg2: memref<2x1x8xf32, #tpu.memory_space<vmem>>, %arg3: memref<1x128xf32, #tpu.memory_space<vmem>>, %arg4: memref<1x128xf32, #tpu.memory_space<vmem>>, %arg5: memref<1x128x384xbf16, #tpu.memory_space<vmem>>, %arg6: memref<1x1x384xf32, #tpu.memory_space<vmem>>, %arg7: memref<1x128x128xbf16, #tpu.memory_space<vmem>>, %arg8: memref<1x1x128xf32, #tpu.memory_space<vmem>>, %arg9: memref<1x1x128xf32, #tpu.memory_space<vmem>>, %arg10: memref<1x1x128xf32, #tpu.memory_space<vmem>>, %arg11: memref<1x128x128xbf16, #tpu.memory_space<vmem>>, %arg12: memref<1x1x128xf32, #tpu.memory_space<vmem>>, %arg13: memref<1x128x128xbf16, #tpu.memory_space<vmem>>, %arg14: memref<1x1x128xf32, #tpu.memory_space<vmem>>, %arg15: memref<1x1x128xf32, #tpu.memory_space<vmem>>, %arg16: memref<1x1x128xf32, #tpu.memory_space<vmem>>, %arg17: memref<16x128xf32, #tpu.memory_space<vmem>>) attributes {dimension_semantics = [#tpu.dimension_semantics<arbitrary>], iteration_bounds = array<i64: 2>, scalar_prefetch = 0 : i64, scratch_operands = 0 : i64, tpu.core_type = #tpu.core_type<tc>, window_params = [{pipeline_mode = #tpu.pipeline_mode<synchronous>, transform_indices = @transform_0, window_bounds = array<i64: 16, 128>}, {pipeline_mode = #tpu.pipeline_mode<synchronous>, transform_indices = @transform_1, window_bounds = array<i64: 2, 1, 8>}, {pipeline_mode = #tpu.pipeline_mode<synchronous>, transform_indices = @transform_2, window_bounds = array<i64: 1, 128>}, {pipeline_mode = #tpu.pipeline_mode<synchronous>, transform_indices = @transform_3, window_bounds = array<i64: 1, 128>}, {transform_indices = @transform_4, window_bounds = array<i64: 1, 128, 384>}, {transform_indices = @transform_5, window_bounds = array<i64: 1, 1, 384>}, {transform_indices = @transform_6, window_bounds = array<i64: 1, 128, 128>}, {transform_indices = @transform_7, window_bounds = array<i64: 1, 1, 128>}, {transform_indices = @transform_8, window_bounds = array<i64: 1, 1, 128>}, {transform_indices = @transform_9, window_bounds = array<i64: 1, 1, 128>}, {transform_indices = @transform_10, window_bounds = array<i64: 1, 128, 128>}, {transform_indices = @transform_11, window_bounds = array<i64: 1, 1, 128>}, {transform_indices = @transform_12, window_bounds = array<i64: 1, 128, 128>}, {transform_indices = @transform_13, window_bounds = array<i64: 1, 1, 128>}, {transform_indices = @transform_14, window_bounds = array<i64: 1, 1, 128>}, {transform_indices = @transform_15, window_bounds = array<i64: 1, 1, 128>}, {pipeline_mode = #tpu.pipeline_mode<synchronous>, transform_indices = @transform_16, window_bounds = array<i64: 16, 128>}]} {
    %0 = tpu.iota {dimensions = array<i32: 1>} : vector<1x128xi32>
    %c32_i32 = arith.constant 32 : i32
    %1 = vector.broadcast %c32_i32 : i32 to vector<1x128xi32>
    %2 = arith.cmpi slt, %0, %1 : vector<1x128xi32>
    %c0_i32 = arith.constant 0 : i32
    %3 = arith.cmpi eq, %arg0, %c0_i32 : i32
    %4 = arith.extui %3 : i1 to i32
    %c0_i32_0 = arith.constant 0 : i32
    %5 = arith.cmpi ne, %4, %c0_i32_0 : i32
    scf.if %5 {
      %c0_101 = arith.constant 0 : index
      %c0_102 = arith.constant 0 : index
      %257 = vector.load %arg1[%c0_101, %c0_102] : memref<16x128xf32, #tpu.memory_space<vmem>>, vector<16x128xf32>
      %c0_103 = arith.constant 0 : index
      %c0_104 = arith.constant 0 : index
      %258 = vector.load %arg3[%c0_103, %c0_104] : memref<1x128xf32, #tpu.memory_space<vmem>>, vector<1x128xf32>
      %c0_105 = arith.constant 0 : index
      %c0_106 = arith.constant 0 : index
      %259 = vector.load %arg4[%c0_105, %c0_106] : memref<1x128xf32, #tpu.memory_space<vmem>>, vector<1x128xf32>
      %cst_107 = arith.constant dense<0.000000e+00> : vector<16xf32>
      %260 = vector.multi_reduction <add>, %257, %cst_107 [1] : vector<16x128xf32> to vector<16xf32>
      %261 = vector.shape_cast %260 : vector<16xf32> to vector<16x1xf32>
      %cst_108 = arith.constant 3.125000e-02 : f32
      %262 = vector.broadcast %cst_108 : f32 to vector<16x1xf32>
      %263 = arith.mulf %261, %262 : vector<16x1xf32>
      %264 = vector.broadcast %263 : vector<16x1xf32> to vector<16x128xf32>
      %265 = arith.subf %257, %264 : vector<16x128xf32>
      %cst_109 = arith.constant 0.000000e+00 : f32
      %266 = vector.shape_cast %2 : vector<1x128xi1> to vector<1x128xi1>
      %267 = vector.broadcast %266 : vector<1x128xi1> to vector<16x128xi1>
      %268 = vector.broadcast %cst_109 : f32 to vector<16x128xf32>
      %269 = arith.select %267, %265, %268 : vector<16x128xi1>, vector<16x128xf32>
      %270 = arith.mulf %269, %269 : vector<16x128xf32>
      %cst_110 = arith.constant dense<0.000000e+00> : vector<16xf32>
      %271 = vector.multi_reduction <add>, %270, %cst_110 [1] : vector<16x128xf32> to vector<16xf32>
      %272 = vector.shape_cast %271 : vector<16xf32> to vector<16x1xf32>
      %cst_111 = arith.constant 3.125000e-02 : f32
      %273 = vector.broadcast %cst_111 : f32 to vector<16x1xf32>
      %274 = arith.mulf %272, %273 : vector<16x1xf32>
      %cst_112 = arith.constant 9.99999996E-13 : f32
      %275 = vector.broadcast %cst_112 : f32 to vector<16x1xf32>
      %276 = arith.addf %274, %275 : vector<16x1xf32>
      %277 = math.rsqrt %276 : vector<16x1xf32>
      %278 = vector.broadcast %277 : vector<16x1xf32> to vector<16x128xf32>
      %279 = arith.mulf %269, %278 : vector<16x128xf32>
      %280 = vector.broadcast %258 : vector<1x128xf32> to vector<16x128xf32>
      %281 = arith.mulf %279, %280 : vector<16x128xf32>
      %282 = vector.broadcast %259 : vector<1x128xf32> to vector<16x128xf32>
      %283 = arith.addf %281, %282 : vector<16x128xf32>
      %c0_113 = arith.constant 0 : index
      %c0_114 = arith.constant 0 : index
      %284 = vector.load %arg17[%c0_113, %c0_114] : memref<16x128xf32, #tpu.memory_space<vmem>>, vector<16x128xf32>
      tpu.vector_store %arg17[%c0_113, %c0_114], %283 {strides = array<i32>} : memref<16x128xf32, #tpu.memory_space<vmem>>, vector<16x128xf32>,
    } else {
    }
    %c0 = arith.constant 0 : index
    %c0_1 = arith.constant 0 : index
    %6 = vector.load %arg17[%c0, %c0_1] : memref<16x128xf32, #tpu.memory_space<vmem>>, vector<16x128xf32>
    %7 = arith.truncf %6 : vector<16x128xf32> to vector<16x128xbf16>
    %c0_2 = arith.constant 0 : index
    %c0_3 = arith.constant 0 : index
    %c0_4 = arith.constant 0 : index
    %8 = vector.load %arg5[%c0_2, %c0_3, %c0_4] : memref<1x128x384xbf16, #tpu.memory_space<vmem>>, vector<1x128x384xbf16>
    %9 = vector.shape_cast %8 : vector<1x128x384xbf16> to vector<128x384xbf16>
    %cst = arith.constant dense<0.000000e+00> : vector<16x384xf32>
    %10 = tpu.matmul %7, %9, %cst {dimension_numbers = #tpu.dot_dimension_numbers<[1], [0], [0], [1], [0, 0, 1, 1], [], []>} : vector<16x128xbf16>, vector<128x384xbf16>, vector<16x384xf32> -> vector<16x384xf32>
    %c0_5 = arith.constant 0 : index
    %c0_6 = arith.constant 0 : index
    %c0_7 = arith.constant 0 : index
    %11 = vector.load %arg6[%c0_5, %c0_6, %c0_7] : memref<1x1x384xf32, #tpu.memory_space<vmem>>, vector<1x1x384xf32>
    %12 = vector.shape_cast %11 : vector<1x1x384xf32> to vector<1x384xf32>
    %13 = vector.broadcast %12 : vector<1x384xf32> to vector<16x384xf32>
    %14 = arith.addf %10, %13 : vector<16x384xf32>
    %15 = vector.extract_strided_slice %14 {offsets = [0, 0], sizes = [16, 128], strides = [1, 1]} : vector<16x384xf32> to vector<16x128xf32>
    %16 = vector.extract_strided_slice %14 {offsets = [0, 128], sizes = [16, 128], strides = [1, 1]} : vector<16x384xf32> to vector<16x128xf32>
    %17 = arith.truncf %16 : vector<16x128xf32> to vector<16x128xbf16>
    %18 = vector.extract_strided_slice %14 {offsets = [0, 256], sizes = [16, 128], strides = [1, 1]} : vector<16x384xf32> to vector<16x128xf32>
    %19 = arith.truncf %18 : vector<16x128xf32> to vector<16x128xbf16>
    %20 = vector.extract_strided_slice %15 {offsets = [0, 0], sizes = [8, 128], strides = [1, 1]} : vector<16x128xf32> to vector<8x128xf32>
    %21 = vector.extract_strided_slice %17 {offsets = [0, 0], sizes = [8, 128], strides = [1, 1]} : vector<16x128xbf16> to vector<8x128xbf16>
    %22 = vector.extract_strided_slice %19 {offsets = [0, 0], sizes = [8, 128], strides = [1, 1]} : vector<16x128xbf16> to vector<8x128xbf16>
    %c0_8 = arith.constant 0 : index
    %c0_9 = arith.constant 0 : index
    %c0_10 = arith.constant 0 : index
    %23 = vector.load %arg2[%c0_8, %c0_9, %c0_10] : memref<2x1x8xf32, #tpu.memory_space<vmem>>, vector<1x1x8xf32>
    %24 = vector.shape_cast %23 : vector<1x1x8xf32> to vector<1x8xf32>
    %cst_11 = arith.constant 0.000000e+00 : f32
    %25 = vector.broadcast %cst_11 : f32 to vector<8x128xf32>
    %c0_i32_12 = arith.constant 0 : i32
    %26 = vector.broadcast %c0_i32_12 : i32 to vector<1x128xi32>
    %27 = arith.cmpi sge, %0, %26 : vector<1x128xi32>
    %c16_i32 = arith.constant 16 : i32
    %28 = vector.broadcast %c16_i32 : i32 to vector<1x128xi32>
    %29 = arith.cmpi slt, %0, %28 : vector<1x128xi32>
    %30 = arith.andi %27, %29 : vector<1x128xi1>
    %cst_13 = arith.constant 0.000000e+00 : f32
    %31 = vector.shape_cast %30 : vector<1x128xi1> to vector<1x128xi1>
    %32 = vector.broadcast %31 : vector<1x128xi1> to vector<8x128xi1>
    %33 = vector.broadcast %cst_13 : f32 to vector<8x128xf32>
    %34 = arith.select %32, %20, %33 : vector<8x128xi1>, vector<8x128xf32>
    %35 = arith.truncf %34 : vector<8x128xf32> to vector<8x128xbf16>
    %cst_14 = arith.constant dense<0.000000e+00> : vector<8x8xf32>
    %36 = tpu.matmul %35, %21, %cst_14 {dimension_numbers = #tpu.dot_dimension_numbers<[1], [1], [0], [0], [0, 0, 1, 0], [], []>} : vector<8x128xbf16>, vector<8x128xbf16>, vector<8x8xf32> -> vector<8x8xf32>
    %cst_15 = arith.constant 2.500000e-01 : f32
    %37 = vector.broadcast %cst_15 : f32 to vector<8x8xf32>
    %38 = arith.mulf %36, %37 : vector<8x8xf32>
    %39 = vector.broadcast %24 : vector<1x8xf32> to vector<8x8xf32>
    %40 = arith.addf %38, %39 : vector<8x8xf32>
    %cst_16 = arith.constant dense<0xFF800000> : vector<8xf32>
    %41 = vector.multi_reduction <maximumf>, %40, %cst_16 [1] : vector<8x8xf32> to vector<8xf32>
    %42 = vector.shape_cast %41 : vector<8xf32> to vector<8x1xf32>
    %43 = vector.broadcast %42 : vector<8x1xf32> to vector<8x8xf32>
    %44 = arith.subf %40, %43 : vector<8x8xf32>
    %45 = math.exp %44 : vector<8x8xf32>
    %cst_17 = arith.constant dense<0.000000e+00> : vector<8xf32>
    %46 = vector.multi_reduction <add>, %45, %cst_17 [1] : vector<8x8xf32> to vector<8xf32>
    %47 = vector.shape_cast %46 : vector<8xf32> to vector<8x1xf32>
    %48 = tpu.reciprocal %47 {approx = true} : vector<8x1xf32> -> vector<8x1xf32>
    %49 = vector.broadcast %48 : vector<8x1xf32> to vector<8x8xf32>
    %50 = arith.mulf %45, %49 : vector<8x8xf32>
    %51 = arith.truncf %50 : vector<8x8xf32> to vector<8x8xbf16>
    %cst_18 = arith.constant dense<0.000000e+00> : vector<8x128xf32>
    %52 = tpu.matmul %51, %22, %cst_18 {dimension_numbers = #tpu.dot_dimension_numbers<[1], [0], [0], [1], [0, 0, 1, 1], [], []>} : vector<8x8xbf16>, vector<8x128xbf16>, vector<8x128xf32> -> vector<8x128xf32>
    %cst_19 = arith.constant 0.000000e+00 : f32
    %53 = vector.shape_cast %30 : vector<1x128xi1> to vector<1x128xi1>
    %54 = vector.broadcast %53 : vector<1x128xi1> to vector<8x128xi1>
    %55 = vector.broadcast %cst_19 : f32 to vector<8x128xf32>
    %56 = arith.select %54, %52, %55 : vector<8x128xi1>, vector<8x128xf32>
    %57 = arith.addf %25, %56 : vector<8x128xf32>
    %c16_i32_20 = arith.constant 16 : i32
    %58 = vector.broadcast %c16_i32_20 : i32 to vector<1x128xi32>
    %59 = arith.cmpi sge, %0, %58 : vector<1x128xi32>
    %c32_i32_21 = arith.constant 32 : i32
    %60 = vector.broadcast %c32_i32_21 : i32 to vector<1x128xi32>
    %61 = arith.cmpi slt, %0, %60 : vector<1x128xi32>
    %62 = arith.andi %59, %61 : vector<1x128xi1>
    %cst_22 = arith.constant 0.000000e+00 : f32
    %63 = vector.shape_cast %62 : vector<1x128xi1> to vector<1x128xi1>
    %64 = vector.broadcast %63 : vector<1x128xi1> to vector<8x128xi1>
    %65 = vector.broadcast %cst_22 : f32 to vector<8x128xf32>
    %66 = arith.select %64, %20, %65 : vector<8x128xi1>, vector<8x128xf32>
    %67 = arith.truncf %66 : vector<8x128xf32> to vector<8x128xbf16>
    %cst_23 = arith.constant dense<0.000000e+00> : vector<8x8xf32>
    %68 = tpu.matmul %67, %21, %cst_23 {dimension_numbers = #tpu.dot_dimension_numbers<[1], [1], [0], [0], [0, 0, 1, 0], [], []>} : vector<8x128xbf16>, vector<8x128xbf16>, vector<8x8xf32> -> vector<8x8xf32>
    %cst_24 = arith.constant 2.500000e-01 : f32
    %69 = vector.broadcast %cst_24 : f32 to vector<8x8xf32>
    %70 = arith.mulf %68, %69 : vector<8x8xf32>
    %71 = vector.broadcast %24 : vector<1x8xf32> to vector<8x8xf32>
    %72 = arith.addf %70, %71 : vector<8x8xf32>
    %cst_25 = arith.constant dense<0xFF800000> : vector<8xf32>
    %73 = vector.multi_reduction <maximumf>, %72, %cst_25 [1] : vector<8x8xf32> to vector<8xf32>
    %74 = vector.shape_cast %73 : vector<8xf32> to vector<8x1xf32>
    %75 = vector.broadcast %74 : vector<8x1xf32> to vector<8x8xf32>
    %76 = arith.subf %72, %75 : vector<8x8xf32>
    %77 = math.exp %76 : vector<8x8xf32>
    %cst_26 = arith.constant dense<0.000000e+00> : vector<8xf32>
    %78 = vector.multi_reduction <add>, %77, %cst_26 [1] : vector<8x8xf32> to vector<8xf32>
    %79 = vector.shape_cast %78 : vector<8xf32> to vector<8x1xf32>
    %80 = tpu.reciprocal %79 {approx = true} : vector<8x1xf32> -> vector<8x1xf32>
    %81 = vector.broadcast %80 : vector<8x1xf32> to vector<8x8xf32>
    %82 = arith.mulf %77, %81 : vector<8x8xf32>
    %83 = arith.truncf %82 : vector<8x8xf32> to vector<8x8xbf16>
    %cst_27 = arith.constant dense<0.000000e+00> : vector<8x128xf32>
    %84 = tpu.matmul %83, %22, %cst_27 {dimension_numbers = #tpu.dot_dimension_numbers<[1], [0], [0], [1], [0, 0, 1, 1], [], []>} : vector<8x8xbf16>, vector<8x128xbf16>, vector<8x128xf32> -> vector<8x128xf32>
    %cst_28 = arith.constant 0.000000e+00 : f32
    %85 = vector.shape_cast %62 : vector<1x128xi1> to vector<1x128xi1>
    %86 = vector.broadcast %85 : vector<1x128xi1> to vector<8x128xi1>
    %87 = vector.broadcast %cst_28 : f32 to vector<8x128xf32>
    %88 = arith.select %86, %84, %87 : vector<8x128xi1>, vector<8x128xf32>
    %89 = arith.addf %57, %88 : vector<8x128xf32>
    %90 = vector.extract_strided_slice %15 {offsets = [8, 0], sizes = [8, 128], strides = [1, 1]} : vector<16x128xf32> to vector<8x128xf32>
    %91 = vector.extract_strided_slice %17 {offsets = [8, 0], sizes = [8, 128], strides = [1, 1]} : vector<16x128xbf16> to vector<8x128xbf16>
    %92 = vector.extract_strided_slice %19 {offsets = [8, 0], sizes = [8, 128], strides = [1, 1]} : vector<16x128xbf16> to vector<8x128xbf16>
    %c1 = arith.constant 1 : index
    %c0_29 = arith.constant 0 : index
    %c0_30 = arith.constant 0 : index
    %93 = vector.load %arg2[%c1, %c0_29, %c0_30] : memref<2x1x8xf32, #tpu.memory_space<vmem>>, vector<1x1x8xf32>
    %94 = vector.shape_cast %93 : vector<1x1x8xf32> to vector<1x8xf32>
    %cst_31 = arith.constant 0.000000e+00 : f32
    %95 = vector.broadcast %cst_31 : f32 to vector<8x128xf32>
    %c0_i32_32 = arith.constant 0 : i32
    %96 = vector.broadcast %c0_i32_32 : i32 to vector<1x128xi32>
    %97 = arith.cmpi sge, %0, %96 : vector<1x128xi32>
    %c16_i32_33 = arith.constant 16 : i32
    %98 = vector.broadcast %c16_i32_33 : i32 to vector<1x128xi32>
    %99 = arith.cmpi slt, %0, %98 : vector<1x128xi32>
    %100 = arith.andi %97, %99 : vector<1x128xi1>
    %cst_34 = arith.constant 0.000000e+00 : f32
    %101 = vector.shape_cast %100 : vector<1x128xi1> to vector<1x128xi1>
    %102 = vector.broadcast %101 : vector<1x128xi1> to vector<8x128xi1>
    %103 = vector.broadcast %cst_34 : f32 to vector<8x128xf32>
    %104 = arith.select %102, %90, %103 : vector<8x128xi1>, vector<8x128xf32>
    %105 = arith.truncf %104 : vector<8x128xf32> to vector<8x128xbf16>
    %cst_35 = arith.constant dense<0.000000e+00> : vector<8x8xf32>
    %106 = tpu.matmul %105, %91, %cst_35 {dimension_numbers = #tpu.dot_dimension_numbers<[1], [1], [0], [0], [0, 0, 1, 0], [], []>} : vector<8x128xbf16>, vector<8x128xbf16>, vector<8x8xf32> -> vector<8x8xf32>
    %cst_36 = arith.constant 2.500000e-01 : f32
    %107 = vector.broadcast %cst_36 : f32 to vector<8x8xf32>
    %108 = arith.mulf %106, %107 : vector<8x8xf32>
    %109 = vector.broadcast %94 : vector<1x8xf32> to vector<8x8xf32>
    %110 = arith.addf %108, %109 : vector<8x8xf32>
    %cst_37 = arith.constant dense<0xFF800000> : vector<8xf32>
    %111 = vector.multi_reduction <maximumf>, %110, %cst_37 [1] : vector<8x8xf32> to vector<8xf32>
    %112 = vector.shape_cast %111 : vector<8xf32> to vector<8x1xf32>
    %113 = vector.broadcast %112 : vector<8x1xf32> to vector<8x8xf32>
    %114 = arith.subf %110, %113 : vector<8x8xf32>
    %115 = math.exp %114 : vector<8x8xf32>
    %cst_38 = arith.constant dense<0.000000e+00> : vector<8xf32>
    %116 = vector.multi_reduction <add>, %115, %cst_38 [1] : vector<8x8xf32> to vector<8xf32>
    %117 = vector.shape_cast %116 : vector<8xf32> to vector<8x1xf32>
    %118 = tpu.reciprocal %117 {approx = true} : vector<8x1xf32> -> vector<8x1xf32>
    %119 = vector.broadcast %118 : vector<8x1xf32> to vector<8x8xf32>
    %120 = arith.mulf %115, %119 : vector<8x8xf32>
    %121 = arith.truncf %120 : vector<8x8xf32> to vector<8x8xbf16>
    %cst_39 = arith.constant dense<0.000000e+00> : vector<8x128xf32>
    %122 = tpu.matmul %121, %92, %cst_39 {dimension_numbers = #tpu.dot_dimension_numbers<[1], [0], [0], [1], [0, 0, 1, 1], [], []>} : vector<8x8xbf16>, vector<8x128xbf16>, vector<8x128xf32> -> vector<8x128xf32>
    %cst_40 = arith.constant 0.000000e+00 : f32
    %123 = vector.shape_cast %100 : vector<1x128xi1> to vector<1x128xi1>
    %124 = vector.broadcast %123 : vector<1x128xi1> to vector<8x128xi1>
    %125 = vector.broadcast %cst_40 : f32 to vector<8x128xf32>
    %126 = arith.select %124, %122, %125 : vector<8x128xi1>, vector<8x128xf32>
    %127 = arith.addf %95, %126 : vector<8x128xf32>
    %c16_i32_41 = arith.constant 16 : i32
    %128 = vector.broadcast %c16_i32_41 : i32 to vector<1x128xi32>
    %129 = arith.cmpi sge, %0, %128 : vector<1x128xi32>
    %c32_i32_42 = arith.constant 32 : i32
    %130 = vector.broadcast %c32_i32_42 : i32 to vector<1x128xi32>
    %131 = arith.cmpi slt, %0, %130 : vector<1x128xi32>
    %132 = arith.andi %129, %131 : vector<1x128xi1>
    %cst_43 = arith.constant 0.000000e+00 : f32
    %133 = vector.shape_cast %132 : vector<1x128xi1> to vector<1x128xi1>
    %134 = vector.broadcast %133 : vector<1x128xi1> to vector<8x128xi1>
    %135 = vector.broadcast %cst_43 : f32 to vector<8x128xf32>
    %136 = arith.select %134, %90, %135 : vector<8x128xi1>, vector<8x128xf32>
    %137 = arith.truncf %136 : vector<8x128xf32> to vector<8x128xbf16>
    %cst_44 = arith.constant dense<0.000000e+00> : vector<8x8xf32>
    %138 = tpu.matmul %137, %91, %cst_44 {dimension_numbers = #tpu.dot_dimension_numbers<[1], [1], [0], [0], [0, 0, 1, 0], [], []>} : vector<8x128xbf16>, vector<8x128xbf16>, vector<8x8xf32> -> vector<8x8xf32>
    %cst_45 = arith.constant 2.500000e-01 : f32
    %139 = vector.broadcast %cst_45 : f32 to vector<8x8xf32>
    %140 = arith.mulf %138, %139 : vector<8x8xf32>
    %141 = vector.broadcast %94 : vector<1x8xf32> to vector<8x8xf32>
    %142 = arith.addf %140, %141 : vector<8x8xf32>
    %cst_46 = arith.constant dense<0xFF800000> : vector<8xf32>
    %143 = vector.multi_reduction <maximumf>, %142, %cst_46 [1] : vector<8x8xf32> to vector<8xf32>
    %144 = vector.shape_cast %143 : vector<8xf32> to vector<8x1xf32>
    %145 = vector.broadcast %144 : vector<8x1xf32> to vector<8x8xf32>
    %146 = arith.subf %142, %145 : vector<8x8xf32>
    %147 = math.exp %146 : vector<8x8xf32>
    %cst_47 = arith.constant dense<0.000000e+00> : vector<8xf32>
    %148 = vector.multi_reduction <add>, %147, %cst_47 [1] : vector<8x8xf32> to vector<8xf32>
    %149 = vector.shape_cast %148 : vector<8xf32> to vector<8x1xf32>
    %150 = tpu.reciprocal %149 {approx = true} : vector<8x1xf32> -> vector<8x1xf32>
    %151 = vector.broadcast %150 : vector<8x1xf32> to vector<8x8xf32>
    %152 = arith.mulf %147, %151 : vector<8x8xf32>
    %153 = arith.truncf %152 : vector<8x8xf32> to vector<8x8xbf16>
    %cst_48 = arith.constant dense<0.000000e+00> : vector<8x128xf32>
    %154 = tpu.matmul %153, %92, %cst_48 {dimension_numbers = #tpu.dot_dimension_numbers<[1], [0], [0], [1], [0, 0, 1, 1], [], []>} : vector<8x8xbf16>, vector<8x128xbf16>, vector<8x128xf32> -> vector<8x128xf32>
    %cst_49 = arith.constant 0.000000e+00 : f32
    %155 = vector.shape_cast %132 : vector<1x128xi1> to vector<1x128xi1>
    %156 = vector.broadcast %155 : vector<1x128xi1> to vector<8x128xi1>
    %157 = vector.broadcast %cst_49 : f32 to vector<8x128xf32>
    %158 = arith.select %156, %154, %157 : vector<8x128xi1>, vector<8x128xf32>
    %159 = arith.addf %127, %158 : vector<8x128xf32>
    %160 = tpu.concatenate %89, %159 in 0 : vector<8x128xf32>, vector<8x128xf32> -> vector<16x128xf32>
    %161 = arith.truncf %160 : vector<16x128xf32> to vector<16x128xbf16>
    %c0_50 = arith.constant 0 : index
    %c0_51 = arith.constant 0 : index
    %c0_52 = arith.constant 0 : index
    %162 = vector.load %arg7[%c0_50, %c0_51, %c0_52] : memref<1x128x128xbf16, #tpu.memory_space<vmem>>, vector<1x128x128xbf16>
    %163 = vector.shape_cast %162 : vector<1x128x128xbf16> to vector<128x128xbf16>
    %cst_53 = arith.constant dense<0.000000e+00> : vector<16x128xf32>
    %164 = tpu.matmul %161, %163, %cst_53 {dimension_numbers = #tpu.dot_dimension_numbers<[1], [0], [0], [1], [0, 0, 1, 1], [], []>} : vector<16x128xbf16>, vector<128x128xbf16>, vector<16x128xf32> -> vector<16x128xf32>
    %c0_54 = arith.constant 0 : index
    %c0_55 = arith.constant 0 : index
    %c0_56 = arith.constant 0 : index
    %165 = vector.load %arg8[%c0_54, %c0_55, %c0_56] : memref<1x1x128xf32, #tpu.memory_space<vmem>>, vector<1x1x128xf32>
    %166 = vector.shape_cast %165 : vector<1x1x128xf32> to vector<1x128xf32>
    %167 = vector.broadcast %166 : vector<1x128xf32> to vector<16x128xf32>
    %168 = arith.addf %164, %167 : vector<16x128xf32>
    %169 = arith.addf %168, %6 : vector<16x128xf32>
    %c0_57 = arith.constant 0 : index
    %c0_58 = arith.constant 0 : index
    %c0_59 = arith.constant 0 : index
    %170 = vector.load %arg9[%c0_57, %c0_58, %c0_59] : memref<1x1x128xf32, #tpu.memory_space<vmem>>, vector<1x1x128xf32>
    %171 = vector.shape_cast %170 : vector<1x1x128xf32> to vector<1x128xf32>
    %c0_60 = arith.constant 0 : index
    %c0_61 = arith.constant 0 : index
    %c0_62 = arith.constant 0 : index
    %172 = vector.load %arg10[%c0_60, %c0_61, %c0_62] : memref<1x1x128xf32, #tpu.memory_space<vmem>>, vector<1x1x128xf32>
    %173 = vector.shape_cast %172 : vector<1x1x128xf32> to vector<1x128xf32>
    %cst_63 = arith.constant dense<0.000000e+00> : vector<16xf32>
    %174 = vector.multi_reduction <add>, %169, %cst_63 [1] : vector<16x128xf32> to vector<16xf32>
    %175 = vector.shape_cast %174 : vector<16xf32> to vector<16x1xf32>
    %cst_64 = arith.constant 3.125000e-02 : f32
    %176 = vector.broadcast %cst_64 : f32 to vector<16x1xf32>
    %177 = arith.mulf %175, %176 : vector<16x1xf32>
    %178 = vector.broadcast %177 : vector<16x1xf32> to vector<16x128xf32>
    %179 = arith.subf %169, %178 : vector<16x128xf32>
    %cst_65 = arith.constant 0.000000e+00 : f32
    %180 = vector.shape_cast %2 : vector<1x128xi1> to vector<1x128xi1>
    %181 = vector.broadcast %180 : vector<1x128xi1> to vector<16x128xi1>
    %182 = vector.broadcast %cst_65 : f32 to vector<16x128xf32>
    %183 = arith.select %181, %179, %182 : vector<16x128xi1>, vector<16x128xf32>
    %184 = arith.mulf %183, %183 : vector<16x128xf32>
    %cst_66 = arith.constant dense<0.000000e+00> : vector<16xf32>
    %185 = vector.multi_reduction <add>, %184, %cst_66 [1] : vector<16x128xf32> to vector<16xf32>
    %186 = vector.shape_cast %185 : vector<16xf32> to vector<16x1xf32>
    %cst_67 = arith.constant 3.125000e-02 : f32
    %187 = vector.broadcast %cst_67 : f32 to vector<16x1xf32>
    %188 = arith.mulf %186, %187 : vector<16x1xf32>
    %cst_68 = arith.constant 9.99999996E-13 : f32
    %189 = vector.broadcast %cst_68 : f32 to vector<16x1xf32>
    %190 = arith.addf %188, %189 : vector<16x1xf32>
    %191 = math.rsqrt %190 : vector<16x1xf32>
    %192 = vector.broadcast %191 : vector<16x1xf32> to vector<16x128xf32>
    %193 = arith.mulf %183, %192 : vector<16x128xf32>
    %194 = vector.broadcast %171 : vector<1x128xf32> to vector<16x128xf32>
    %195 = arith.mulf %193, %194 : vector<16x128xf32>
    %196 = vector.broadcast %173 : vector<1x128xf32> to vector<16x128xf32>
    %197 = arith.addf %195, %196 : vector<16x128xf32>
    %198 = arith.truncf %197 : vector<16x128xf32> to vector<16x128xbf16>
    %c0_69 = arith.constant 0 : index
    %c0_70 = arith.constant 0 : index
    %c0_71 = arith.constant 0 : index
    %199 = vector.load %arg11[%c0_69, %c0_70, %c0_71] : memref<1x128x128xbf16, #tpu.memory_space<vmem>>, vector<1x128x128xbf16>
    %200 = vector.shape_cast %199 : vector<1x128x128xbf16> to vector<128x128xbf16>
    %cst_72 = arith.constant dense<0.000000e+00> : vector<16x128xf32>
    %201 = tpu.matmul %198, %200, %cst_72 {dimension_numbers = #tpu.dot_dimension_numbers<[1], [0], [0], [1], [0, 0, 1, 1], [], []>} : vector<16x128xbf16>, vector<128x128xbf16>, vector<16x128xf32> -> vector<16x128xf32>
    %c0_73 = arith.constant 0 : index
    %c0_74 = arith.constant 0 : index
    %c0_75 = arith.constant 0 : index
    %202 = vector.load %arg12[%c0_73, %c0_74, %c0_75] : memref<1x1x128xf32, #tpu.memory_space<vmem>>, vector<1x1x128xf32>
    %203 = vector.shape_cast %202 : vector<1x1x128xf32> to vector<1x128xf32>
    %204 = vector.broadcast %203 : vector<1x128xf32> to vector<16x128xf32>
    %205 = arith.addf %201, %204 : vector<16x128xf32>
    %206 = arith.mulf %205, %205 : vector<16x128xf32>
    %207 = arith.mulf %205, %206 : vector<16x128xf32>
    %cst_76 = arith.constant 4.471500e-02 : f32
    %208 = vector.broadcast %cst_76 : f32 to vector<16x128xf32>
    %209 = arith.mulf %208, %207 : vector<16x128xf32>
    %210 = arith.addf %205, %209 : vector<16x128xf32>
    %cst_77 = arith.constant 0.797884583 : f32
    %211 = vector.broadcast %cst_77 : f32 to vector<16x128xf32>
    %212 = arith.mulf %211, %210 : vector<16x128xf32>
    %213 = math.tanh %212 : vector<16x128xf32>
    %cst_78 = arith.constant 1.000000e+00 : f32
    %214 = vector.broadcast %cst_78 : f32 to vector<16x128xf32>
    %215 = arith.addf %214, %213 : vector<16x128xf32>
    %cst_79 = arith.constant 5.000000e-01 : f32
    %216 = vector.broadcast %cst_79 : f32 to vector<16x128xf32>
    %217 = arith.mulf %216, %215 : vector<16x128xf32>
    %218 = arith.mulf %205, %217 : vector<16x128xf32>
    %219 = arith.truncf %218 : vector<16x128xf32> to vector<16x128xbf16>
    %c0_80 = arith.constant 0 : index
    %c0_81 = arith.constant 0 : index
    %c0_82 = arith.constant 0 : index
    %220 = vector.load %arg13[%c0_80, %c0_81, %c0_82] : memref<1x128x128xbf16, #tpu.memory_space<vmem>>, vector<1x128x128xbf16>
    %221 = vector.shape_cast %220 : vector<1x128x128xbf16> to vector<128x128xbf16>
    %cst_83 = arith.constant dense<0.000000e+00> : vector<16x128xf32>
    %222 = tpu.matmul %219, %221, %cst_83 {dimension_numbers = #tpu.dot_dimension_numbers<[1], [0], [0], [1], [0, 0, 1, 1], [], []>} : vector<16x128xbf16>, vector<128x128xbf16>, vector<16x128xf32> -> vector<16x128xf32>
    %c0_84 = arith.constant 0 : index
    %c0_85 = arith.constant 0 : index
    %c0_86 = arith.constant 0 : index
    %223 = vector.load %arg14[%c0_84, %c0_85, %c0_86] : memref<1x1x128xf32, #tpu.memory_space<vmem>>, vector<1x1x128xf32>
    %224 = vector.shape_cast %223 : vector<1x1x128xf32> to vector<1x128xf32>
    %225 = vector.broadcast %224 : vector<1x128xf32> to vector<16x128xf32>
    %226 = arith.addf %222, %225 : vector<16x128xf32>
    %227 = arith.addf %226, %197 : vector<16x128xf32>
    %c0_87 = arith.constant 0 : index
    %c0_88 = arith.constant 0 : index
    %c0_89 = arith.constant 0 : index
    %228 = vector.load %arg15[%c0_87, %c0_88, %c0_89] : memref<1x1x128xf32, #tpu.memory_space<vmem>>, vector<1x1x128xf32>
    %229 = vector.shape_cast %228 : vector<1x1x128xf32> to vector<1x128xf32>
    %c0_90 = arith.constant 0 : index
    %c0_91 = arith.constant 0 : index
    %c0_92 = arith.constant 0 : index
    %230 = vector.load %arg16[%c0_90, %c0_91, %c0_92] : memref<1x1x128xf32, #tpu.memory_space<vmem>>, vector<1x1x128xf32>
    %231 = vector.shape_cast %230 : vector<1x1x128xf32> to vector<1x128xf32>
    %cst_93 = arith.constant dense<0.000000e+00> : vector<16xf32>
    %232 = vector.multi_reduction <add>, %227, %cst_93 [1] : vector<16x128xf32> to vector<16xf32>
    %233 = vector.shape_cast %232 : vector<16xf32> to vector<16x1xf32>
    %cst_94 = arith.constant 3.125000e-02 : f32
    %234 = vector.broadcast %cst_94 : f32 to vector<16x1xf32>
    %235 = arith.mulf %233, %234 : vector<16x1xf32>
    %236 = vector.broadcast %235 : vector<16x1xf32> to vector<16x128xf32>
    %237 = arith.subf %227, %236 : vector<16x128xf32>
    %cst_95 = arith.constant 0.000000e+00 : f32
    %238 = vector.shape_cast %2 : vector<1x128xi1> to vector<1x128xi1>
    %239 = vector.broadcast %238 : vector<1x128xi1> to vector<16x128xi1>
    %240 = vector.broadcast %cst_95 : f32 to vector<16x128xf32>
    %241 = arith.select %239, %237, %240 : vector<16x128xi1>, vector<16x128xf32>
    %242 = arith.mulf %241, %241 : vector<16x128xf32>
    %cst_96 = arith.constant dense<0.000000e+00> : vector<16xf32>
    %243 = vector.multi_reduction <add>, %242, %cst_96 [1] : vector<16x128xf32> to vector<16xf32>
    %244 = vector.shape_cast %243 : vector<16xf32> to vector<16x1xf32>
    %cst_97 = arith.constant 3.125000e-02 : f32
    %245 = vector.broadcast %cst_97 : f32 to vector<16x1xf32>
    %246 = arith.mulf %244, %245 : vector<16x1xf32>
    %cst_98 = arith.constant 9.99999996E-13 : f32
    %247 = vector.broadcast %cst_98 : f32 to vector<16x1xf32>
    %248 = arith.addf %246, %247 : vector<16x1xf32>
    %249 = math.rsqrt %248 : vector<16x1xf32>
    %250 = vector.broadcast %249 : vector<16x1xf32> to vector<16x128xf32>
    %251 = arith.mulf %241, %250 : vector<16x128xf32>
    %252 = vector.broadcast %229 : vector<1x128xf32> to vector<16x128xf32>
    %253 = arith.mulf %251, %252 : vector<16x128xf32>
    %254 = vector.broadcast %231 : vector<1x128xf32> to vector<16x128xf32>
    %255 = arith.addf %253, %254 : vector<16x128xf32>
    %c0_99 = arith.constant 0 : index
    %c0_100 = arith.constant 0 : index
    %256 = vector.load %arg17[%c0_99, %c0_100] : memref<16x128xf32, #tpu.memory_space<vmem>>, vector<16x128xf32>
    tpu.vector_store %arg17[%c0_99, %c0_100], %255 {strides = array<i32>} : memref<16x128xf32, #tpu.memory_space<vmem>>, vector<16x128xf32>,
    return
  }
  func.func @transform_0(%arg0: i32) -> (i32, i32) {
    %c0_i32 = arith.constant 0 : i32
    %c0_i32_0 = arith.constant 0 : i32
    %c0_i32_1 = arith.constant 0 : i32
    return %c0_i32, %c0_i32_0 : i32, i32
  }
  func.func @transform_1(%arg0: i32) -> (i32, i32, i32) {
    %c0_i32 = arith.constant 0 : i32
    %c0_i32_0 = arith.constant 0 : i32
    %c0_i32_1 = arith.constant 0 : i32
    %c0_i32_2 = arith.constant 0 : i32
    return %c0_i32, %c0_i32_0, %c0_i32_1 : i32, i32, i32
  }
  func.func @transform_2(%arg0: i32) -> (i32, i32) {
    %c0_i32 = arith.constant 0 : i32
    %c0_i32_0 = arith.constant 0 : i32
    %c0_i32_1 = arith.constant 0 : i32
    return %c0_i32, %c0_i32_0 : i32, i32
  }
  func.func @transform_3(%arg0: i32) -> (i32, i32) {
    %c0_i32 = arith.constant 0 : i32
    %c0_i32_0 = arith.constant 0 : i32
    %c0_i32_1 = arith.constant 0 : i32
    return %c0_i32, %c0_i32_0 : i32, i32
  }
  func.func @transform_4(%arg0: i32) -> (i32, i32, i32) {
    %c0_i32 = arith.constant 0 : i32
    %c0_i32_0 = arith.constant 0 : i32
    %c0_i32_1 = arith.constant 0 : i32
    return %arg0, %c0_i32, %c0_i32_0 : i32, i32, i32
  }
  func.func @transform_5(%arg0: i32) -> (i32, i32, i32) {
    %c0_i32 = arith.constant 0 : i32
    %c0_i32_0 = arith.constant 0 : i32
    %c0_i32_1 = arith.constant 0 : i32
    return %arg0, %c0_i32, %c0_i32_0 : i32, i32, i32
  }
  func.func @transform_6(%arg0: i32) -> (i32, i32, i32) {
    %c0_i32 = arith.constant 0 : i32
    %c0_i32_0 = arith.constant 0 : i32
    %c0_i32_1 = arith.constant 0 : i32
    return %arg0, %c0_i32, %c0_i32_0 : i32, i32, i32
  }
  func.func @transform_7(%arg0: i32) -> (i32, i32, i32) {
    %c0_i32 = arith.constant 0 : i32
    %c0_i32_0 = arith.constant 0 : i32
    %c0_i32_1 = arith.constant 0 : i32
    return %arg0, %c0_i32, %c0_i32_0 : i32, i32, i32
  }
  func.func @transform_8(%arg0: i32) -> (i32, i32, i32) {
    %c0_i32 = arith.constant 0 : i32
    %c0_i32_0 = arith.constant 0 : i32
    %c0_i32_1 = arith.constant 0 : i32
    return %arg0, %c0_i32, %c0_i32_0 : i32, i32, i32
  }
  func.func @transform_9(%arg0: i32) -> (i32, i32, i32) {
    %c0_i32 = arith.constant 0 : i32
    %c0_i32_0 = arith.constant 0 : i32
    %c0_i32_1 = arith.constant 0 : i32
    return %arg0, %c0_i32, %c0_i32_0 : i32, i32, i32
  }
  func.func @transform_10(%arg0: i32) -> (i32, i32, i32) {
    %c0_i32 = arith.constant 0 : i32
    %c0_i32_0 = arith.constant 0 : i32
    %c0_i32_1 = arith.constant 0 : i32
    return %arg0, %c0_i32, %c0_i32_0 : i32, i32, i32
  }
  func.func @transform_11(%arg0: i32) -> (i32, i32, i32) {
    %c0_i32 = arith.constant 0 : i32
    %c0_i32_0 = arith.constant 0 : i32
    %c0_i32_1 = arith.constant 0 : i32
    return %arg0, %c0_i32, %c0_i32_0 : i32, i32, i32
  }
  func.func @transform_12(%arg0: i32) -> (i32, i32, i32) {
    %c0_i32 = arith.constant 0 : i32
    %c0_i32_0 = arith.constant 0 : i32
    %c0_i32_1 = arith.constant 0 : i32
    return %arg0, %c0_i32, %c0_i32_0 : i32, i32, i32
  }
  func.func @transform_13(%arg0: i32) -> (i32, i32, i32) {
    %c0_i32 = arith.constant 0 : i32
    %c0_i32_0 = arith.constant 0 : i32
    %c0_i32_1 = arith.constant 0 : i32
    return %arg0, %c0_i32, %c0_i32_0 : i32, i32, i32
  }
  func.func @transform_14(%arg0: i32) -> (i32, i32, i32) {
    %c0_i32 = arith.constant 0 : i32
    %c0_i32_0 = arith.constant 0 : i32
    %c0_i32_1 = arith.constant 0 : i32
    return %arg0, %c0_i32, %c0_i32_0 : i32, i32, i32
  }
  func.func @transform_15(%arg0: i32) -> (i32, i32, i32) {
    %c0_i32 = arith.constant 0 : i32
    %c0_i32_0 = arith.constant 0 : i32
    %c0_i32_1 = arith.constant 0 : i32
    return %arg0, %c0_i32, %c0_i32_0 : i32, i32, i32
  }
  func.func @transform_16(%arg0: i32) -> (i32, i32) {
    %c0_i32 = arith.constant 0 : i32
    %c0_i32_0 = arith.constant 0 : i32
    %c0_i32_1 = arith.constant 0 : i32
    return %c0_i32, %c0_i32_0 : i32, i32
  }
}

</mosaic_0001>

<bundles_post_ra>
// kernel: bert_wordpiece_encoder_forward.1
= control target key start
LH: loop header
LB: loop body
LE: loop exit
PB: predicated region body
PF: predicated region fallthrough
CT: control target
= control target key end

     0   :  { %s3268_s0 = inlined_call_operand.vmem [shape: f32[16,128], index: 0, kind: input, shape index: {}]   ;;  %s3269_s1 = inlined_call_operand.vmem [shape: f32[2,1,8], index: 1, kind: input, shape index: {}]   ;;  %s3270_s2 = inlined_call_operand.vmem [shape: f32[1,128], index: 2, kind: input, shape index: {}]   ;;  %s3271_s3 = inlined_call_operand.vmem [shape: f32[1,128], index: 3, kind: input, shape index: {}]   ;;  %s3272_s4 = inlined_call_operand.vmem [shape: bf16[2,128,384], index: 4, kind: input, shape index: {}]   ;;  %s3273_s5 = inlined_call_operand.vmem [shape: f32[2,1,384], index: 5, kind: input, shape index: {}]   ;;  %s3274_s6 = inlined_call_operand.vmem [shape: bf16[2,128,128], index: 6, kind: input, shape index: {}]   ;;  %s3275_s7 = inlined_call_operand.vmem [shape: f32[2,1,128], index: 7, kind: input, shape index: {}]   ;;  %s3276_s8 = inlined_call_operand.vmem [shape: f32[2,1,128], index: 8, kind: input, shape index: {}]   ;;  %s3277_s9 = inlined_call_operand.vmem [shape: f32[2,1,128], index: 9, kind: input, shape index: {}]   ;;  %s3278_s10 = inlined_call_operand.hbm [shape: bf16[2,128,128], index: 10, kind: input, shape index: {}]   ;;  %s3279_s11 = inlined_call_operand.vmem [shape: f32[2,1,128], index: 11, kind: input, shape index: {}]   ;;  %s3280_s12 = inlined_call_operand.hbm [shape: bf16[2,128,128], index: 12, kind: input, shape index: {}]   ;;  %s3281_s13 = inlined_call_operand.vmem [shape: f32[2,1,128], index: 13, kind: input, shape index: {}]   ;;  %s3282_s14 = inlined_call_operand.vmem [shape: f32[2,1,128], index: 14, kind: input, shape index: {}]   ;;  %s3283_s15 = inlined_call_operand.vmem [shape: f32[2,1,128], index: 15, kind: input, shape index: {}]   ;;  %s3284_s16 = inlined_call_operand.hbm [shape: f32[16,128], index: 16, kind: output, shape index: {}]  }
   0x1   :  { %3296 = sst [smem:[#allocation16_spill]] %s3268_s0 }
   0x2   :  { %3297 = sst [smem:[#allocation17_spill]] %s3269_s1 }
   0x3   :  { %3298 = sst [smem:[#allocation18_spill]] %s3271_s3 }
   0x4   :  { %3299 = sst [smem:[#allocation19_spill]] %s3272_s4 }
   0x5   :  { %3300 = sst [smem:[#allocation20_spill]] %s3273_s5 }
   0x6   :  { %3301 = sst [smem:[#allocation21_spill]] %s3274_s6 }
   0x7   :  { %3302 = sst [smem:[#allocation22_spill]] %s3278_s10 }
   0x8   :  { %3303 = sst [smem:[#allocation23_spill]] %s3280_s12 }
   0x9   :  { %3304 = sst [smem:[#allocation24_spill]] %s3284_s16 }
   0xa   :  { %21 = vsyncpa [#allocation3], 0 }
   0xb   :  { %23 = vsyncpa [#allocation3 + $0x1], 0 }
   0xc   :  { %24 = vsyncpa [#allocation6], 0 }
   0xd   :  { %26 = vsyncpa [#allocation6 + $0x1], 0 }
   0xe   :  { %27 = vsyncpa [#allocation4], 0  ;;  %s2768_s21 = smov 0   ;;  %s2770_s22 = smov 0  }
   0xf   :  { %s2772_s23 = smov 0   ;;  %s2774_s24 = smov 0  }
  0x10 LB: > { %3305 = sst [smem:[#allocation11_spill]] %s2663_s22  ;;  %s2787_s25 = sadd.s32 4294967295, %s2671_s24   ;;  %s2671_s24 = sphi %s2774_s24, %s3331_s24   ;;  %s2667_s23 = sphi %s2772_s23, %s3334_s23   ;;  %s2663_s22 = sphi %s2770_s22, %s3333_s22   ;;  %s2659_s21 = sphi %s2768_s21, %s3332_s21  }
  0x11   : > { %3306 = sst [smem:[#allocation12_spill]] %s2667_s23  ;;  %s2790_s26 = sadd.s32 1, %s2671_s24  }
  0x12   : > { %3307 = sst [smem:[#allocation13_spill]] %s2790_s26  ;;  %s277_s27 = ssub.s32 %s2671_s24, %s2790_s26 }
  0x13   : > { %s280_s28 = sadd.s32 1, %s2667_s23  ;;  %p278_p0 = scmp.eq.s32.totalorder %s277_s27, 0 }
  0x14   : > { %p287_p1 = scmp.ne.s32.totalorder %s2667_s23, %s2663_s22  ;;  %p288_p2 = scmp.eq.s32.totalorder %s2671_s24, 0 }
  0x15   : > { %p293_p3 = scmp.ne.s32.totalorder %s2663_s22, %s2659_s21  ;;  %p294_p5 = scmp.eq.s32.totalorder %s2787_s25, 0 }
  0x16   : > { %s2800_s29 = scalar_select %p278_p0, %s2667_s23, %s280_s28  }
  0x17   : > { %p289_p4 = por %p288_p2, %p287_p1  ;;  %p2412_p6 = scmp.lt.s32.totalorder %s2671_s24, 2 }
  0x18   : > { %3308 = sst [smem:[#allocation14_spill]] %s2800_s29  ;;  %p2804_p7 = por %p294_p5, %p293_p3 }
  0x19   : > { %s2809_s0 = sand.u32 1, %s2667_s23   ;;  %s3288_s18 = sshll.u32 %s2671_s24, 10 }
  0x1a   : > { %s3309_s30 = scalar_select %p2804_p7, 1, 0 }
  0x1b   : > { %s3287_s17 = sshll.u32 %s2809_s0, 6  ;;  %s3310_s10 = sld [smem:[#allocation22_spill]] }
  0x1c   : > { %s525_s27 = scalar_lea.vmem [#allocation2], %s3287_s17  ;;  %p2824_p8 = pnand %p2412_p6, %p289_p4 }
  0x1d   : > { %s532_s28 = sshll.u32 %s525_s27, 4  ;;  %s2822_s28 = int_to_ptr.vmem [resolvable:$true] %s532_s28 }
  0x1e   : > { %p2545_p11 = pneg %p2824_p8 }
  0x21   : > { %s2818_s21 = scalar_lea.hbm %s3310_s10, %s3288_s18  ;;  %s2548_s17 = scalar_lea.hbm %s3310_s10, 2048 }
  0x22   : > { %s2543_s19 = scalar_lea.hbm %s2818_s21, 1024  ;;  %p2549_p0 = scmp.lt.u32.totalorder %s2818_s21, %s3310_s10 }
  0x23   : > { %p2544_p10 = scmp.ne.s32.totalorder %s2818_s21, %s2543_s19  ;;  %p2550_p1 = scmp.lt.u32.totalorder %s2548_s17, %s2543_s19 }
  0x24   : > { %p2552_p3 = scmp.lt.u32.totalorder %s2543_s19, %s2818_s21 }
  0x25   : > { %p2546_p12 = pnand %p2545_p11, %p2544_p10  ;;  %p2551_p2 = por %p2550_p1, %p2549_p0 }
  0x27   : > { %p2547_p13 = pneg %p2546_p12  ;;  %p2553_p4 = por %p2552_p3, %p2551_p2 }
  0x29   : > { %p2554_p5 = pnand %p2553_p4, %p2547_p13 }
  0x2b   : > { %2557 = shalt.err (!%p2554_p5)
}
  0x2c   : > { %s2558_s23 = scalar_lea.vmem %s2822_s28, 1024  ;;  %s2673_s20 = smov [#allocation2]  }
  0x2d   : > { %p2559_p6 = scmp.ne.s32.totalorder %s2822_s28, %s2558_s23  ;;  %s2563_s27 = sshll.u32 %s2673_s20, 4  ;;  %s2564_s27 = int_to_ptr.vmem [resolvable:$false] %s2563_s27 }
  0x2e   : > { %s2565_s26 = scalar_lea.vmem %s2564_s27, 2048  ;;  %p2566_p9 = scmp.lt.s32.totalorder %s2822_s28, %s2564_s27 }
  0x2f   : > { %p2561_p10 = pnand %p2559_p6, %p2545_p11  ;;  %p2567_p0 = scmp.lt.s32.totalorder %s2565_s26, %s2558_s23 }
  0x31   : > { %p2562_p12 = pneg %p2561_p10  ;;  %p2568_p1 = por %p2567_p0, %p2566_p9 }
  0x33   : > { %p2569_p2 = pnand %p2568_p1, %p2562_p12 }
  0x35   : > { %2572 = shalt.err (!%p2569_p2)
}
  0x36   : > { %s2674_s17 = smov 64   ;;  %s2675_s18 = smov 4  }
  0x37   : > { %s3312_s23 = scalar_lea.sflag [#allocation3], %s2809_s0  ;;  %p585_p9 = scmp.lt.s32.totalorder %s2671_s24, 3 }
  0x38   : > { %2408 = dma.hbm_to_vmem [thread:$0]  (!%p2824_p8), %s2818_s21, 1024, %s2822_s28, %s3312_s23, %s2674_s17, %s2674_s17, %s2675_s18  }
  0x39   : > { %s3313_s19 = sshll.u32 %s2671_s24, 10  ;;  %s3314_s12 = sld [smem:[#allocation23_spill]] }
  0x3a   : > { %p3315_p13 = scmp.ge.s32.totalorder %s2671_s24, 1  ;;  %s3317_s16 = sshll.u32 %s2809_s0, 6 }
  0x3b   : > { %s552_s1 = scalar_lea.vmem [#allocation5], %s3317_s16  ;;  %s549_s21 = scalar_lea.sflag [#allocation6], %s2809_s0 }
  0x3c   : > { %p2870_p3 = pnand %p3315_p13, %p585_p9  ;;  %s559_s3 = sshll.u32 %s552_s1, 4  ;;  %s2876_s3 = int_to_ptr.vmem [resolvable:$true] %s559_s3 }
  0x3f   : > { %s2866_s26 = scalar_lea.hbm %s3314_s12, %s3313_s19  ;;  %s2578_s19 = scalar_lea.hbm %s3314_s12, 2048 }
  0x40   : > { %s2573_s28 = scalar_lea.hbm %s2866_s26, 1024  ;;  %p2579_p10 = scmp.lt.u32.totalorder %s2866_s26, %s3314_s12 }
  0x41   : > { %p2574_p4 = scmp.ne.s32.totalorder %s2866_s26, %s2573_s28  ;;  %p2580_p12 = scmp.lt.u32.totalorder %s2578_s19, %s2573_s28 }
  0x42   : > { %p2582_p1 = scmp.lt.u32.totalorder %s2573_s28, %s2866_s26 }
  0x43   : > { %p2576_p5 = pnand %p2574_p4, %p2545_p11  ;;  %p2581_p0 = por %p2580_p12, %p2579_p10 }
  0x45   : > { %p2577_p6 = pneg %p2576_p5  ;;  %p2583_p2 = por %p2582_p1, %p2581_p0 }
  0x47   : > { %p2584_p9 = pnand %p2583_p2, %p2577_p6 }
  0x49   : > { %2587 = shalt.err (!%p2584_p9)
}
  0x4a   : > { %s2588_s1 = scalar_lea.vmem %s2876_s3, 1024  ;;  %s2676_s16 = smov [#allocation5]  }
  0x4b   : > { %p2589_p13 = scmp.ne.s32.totalorder %s2876_s3, %s2588_s1  ;;  %s2593_s24 = sshll.u32 %s2676_s16, 4  ;;  %s2594_s24 = int_to_ptr.vmem [resolvable:$false] %s2593_s24 }
  0x4c   : > { %s2595_s23 = scalar_lea.vmem %s2594_s24, 2048  ;;  %p2596_p7 = scmp.lt.s32.totalorder %s2876_s3, %s2594_s24 }
  0x4d   : > { %p2591_p4 = pnand %p2589_p13, %p2545_p11  ;;  %p2597_p10 = scmp.lt.s32.totalorder %s2595_s23, %s2588_s1 }
  0x4f   : > { %p2592_p5 = pneg %p2591_p4  ;;  %p2598_p12 = por %p2597_p10, %p2596_p7 }
  0x51   : > { %p2599_p0 = pnand %p2598_p12, %p2592_p5 }
  0x53   : > { %2602 = shalt.err (!%p2599_p0)
}
  0x54   : > { %2411 = dma.hbm_to_vmem [thread:$0]  (!%p2824_p8), %s2866_s26, 1024, %s2876_s3, %s549_s21, %s2674_s17, %s2674_s17, %s2675_s18  }
  0x55   : > { %589 = sbr.rel (%p2870_p3) target bundleno = 3327 (0xcff), region = 84 }
  0x5c   : > { %s591_s28 = sand.u32 1, %s2663_s22   ;;  %p3318_p7 = scmp.ne.s32.totalorder %s3309_s30, 0 }
  0x5d   : > { %s2126_s19 = sshll.u32 %s591_s28, 6  ;;  %s592_s20 = scalar_lea.sflag [#allocation3], %s591_s28 }
  0x5e   : > { %s2910_s27 = scalar_lea.vmem [#allocation2], %s2126_s19 }
  0x5f   : > { %2646 = dma.done.wait (%p3318_p7), %s592_s20, 1024  }
  0x60   : > { %2648 = vsyncadd (%p3318_p7), %s592_s20, 4294966272  ;;  %s601_s29 = scalar_lea.sflag [#allocation6], %s591_s28  ;;  %s2916_s0 = scalar_lea.vmem [#allocation5], %s2126_s19 }
  0x61   : > { %3319 = sst [smem:[#allocation15_spill]] %s2916_s0 }
  0x62   : > { %2650 = dma.done.wait (%p3318_p7), %s601_s29, 1024  }
  0x63   : > { %2652 = vsyncadd (%p3318_p7), %s601_s29, 4294966272  ;;  %p688_p8 = scmp.lt.s32.totalorder %s2787_s25, 1  ;;  %v724_v0 = vlaneseq  ;;  %s3320_s6 = sld [smem:[#allocation21_spill]] }
  0x64   : > { %s3321_s4 = sld [smem:[#allocation19_spill]]  ;;  %s3322_s5 = sld [smem:[#allocation20_spill]] }
  0x65   : > { %s2924_s3 = scalar_select %p688_p8, %s2787_s25, 1  ;;  %v2927_v1 = vand.u32 127, %v724_v0 }
  0x66   : > { %p2131_p11 = scmp.ne.s32.totalorder %s2787_s25, 0 }
  0x67   : > { %s2395_s10 = smul.u32 192, %s2924_s3  ;;  %s2214_s30 = sshll.u32 %s2924_s3, 6  ;;  %vm726_vm0 = vcmp.lt.s32.totalorder %v2927_v1, 32  ;;  %v2132_v21 = vld [vmem:[%s3270_s2] ss:$0 sm:$0xff] (!%p2131_p11) }
  0x68   : > { %s2396_s17 = smul.u32 3, %s2924_s3  ;;  %s707_s18 = scalar_lea.vmem %s3276_s8, %s2924_s3 }
  0x69   : > { %s2936_s21 = scalar_lea.vmem %s3320_s6, %s2214_s30  ;;  %s710_s6 = scalar_lea.vmem %s3277_s9, %s2924_s3 }
  0x6a   : > { %s2941_s24 = scalar_lea.vmem %s3321_s4, %s2395_s10  ;;  %s2950_s12 = scalar_lea.vmem %s3322_s5, %s2396_s17 }
  0x6b   : > { %s713_s16 = scalar_lea.vmem %s3279_s11, %s2924_s3  ;;  %s716_s28 = scalar_lea.vmem %s3281_s13, %s2924_s3 }
  0x6c   : > { %s719_s17 = scalar_lea.vmem %s3282_s14, %s2924_s3  ;;  %s722_s22 = scalar_lea.vmem %s3283_s15, %s2924_s3 }
  0x6d   : > { %730 = sbr.rel (%p2131_p11) target bundleno = 433 (0x1b1), region = 96  ;;  %s3323_s26 = sld [smem:[#allocation16_spill]] (!%p2131_p11) }
  0x6e   : > { %s3324_s20 = sld [smem:[#allocation18_spill]] (!%p2131_p11) }
  0x73   : > { %v731_v2 = vld [vmem:[%s3323_s26] sm:$0xff] (!%p2131_p11)  ;;  %v732_v3 = vld [vmem:[%s3323_s26 + $0x8] sm:$0xff] (!%p2131_p11) }
  0x74   : > { %735 = vadd.xlane.f32.xlu0 %v731_v2  ;;  %v2133_v23 = vld [vmem:[%s3324_s20] ss:$0 sm:$0xff] }
  0x78   : > { %737 = vadd.xlane.f32.xlu0 %v732_v3 }
 0x101   : > { %v736_v4 = vpop.xlane.xlu0 %735 }
 0x102   : > { %v739_v5 = vmul.f32 0.03125, %v736_v4 }
 0x104   : > { %v741_v6 = vsub.f32 %v731_v2, %v739_v5 }
 0x105   : > { %v738_v7 = vpop.xlane.xlu0 %737 }
 0x106   : > { %v740_v8 = vmul.f32 0.03125, %v738_v7  ;;  %v745_v9 = vsel %vm726_vm0, %v741_v6, 0.0 }
 0x107   : > { %v747_v10 = vmul.f32 %v745_v9, %v745_v9 }
 0x108   : > { %v742_v11 = vsub.f32 %v732_v3, %v740_v8 }
 0x109   : > { %749 = vadd.xlane.f32.xlu1 %v747_v10 }
 0x10a   : > { %v746_v12 = vsel %vm726_vm0, %v742_v11, 0.0 }
 0x10b   : > { %v748_v13 = vmul.f32 %v746_v12, %v746_v12 }
 0x10d   : > { %751 = vadd.xlane.f32.xlu1 %v748_v13 }
 0x196   : > { %v750_v14 = vpop.xlane.xlu1 %749 }
 0x197   : > { %v753_v15 = vmul.f32 0.03125, %v750_v14 }
 0x199   : > { %v755_v16 = vadd.f32 1e-12, %v753_v15 }
 0x19a   : > { %v752_v17 = vpop.xlane.xlu1 %751 }
 0x19b   : > { %2455 = vrsqrt.f32 %v755_v16  ;;  %v754_v18 = vmul.f32 0.03125, %v752_v17 }
 0x19d   : > { %v756_v19 = vadd.f32 1e-12, %v754_v18 }
 0x19f   : > { %2457 = vrsqrt.f32 %v756_v19 }
 0x1a5   : > { %v2456_v20 = vpop.eup %2455 }
 0x1a6   : > { %v759_v22 = vmul.f32 %v2456_v20, %v745_v9 }
 0x1a8   : > { %v767_v24 = vmul.f32 %v2132_v21, %v759_v22 }
 0x1a9   : > { %v2458_v25 = vpop.eup %2457 }
 0x1aa   : > { %v775_v26 = vadd.f32 %v2133_v23, %v767_v24  ;;  %v760_v27 = vmul.f32 %v2458_v25, %v746_v12 }
 0x1ac   : > { %777 = vst [vmem:[#allocation7] sm:$0xff] %v775_v26  ;;  %v768_v28 = vmul.f32 %v2132_v21, %v760_v27 }
 0x1ae   : > { %v776_v29 = vadd.f32 %v2133_v23, %v768_v28 }
 0x1b0   : > { %778 = vst [vmem:[#allocation7 + $0x8] sm:$0xff] %v776_v29 }
 0x1b1 PF: > { %v2459_v30 = vld [vmem:[%s2941_s24 + $0x4] ss:$12 sps:$4 sm:$0xff]   ;;  %v2461_v31 = vld [vmem:[%s2941_s24] ss:$12 sps:$4 sm:$0xff]   ;;  %v2677_v32 = vmov 0   ;;  %v2678_v33 = vmov 0.0   ;;  %s3328_s10 = scalar_lea.vmem %s3275_s7, %s2924_s3 }
 0x1b2   : > { %991 = vmatprep.mubr.bf16.mxu0 %v2677_v32  ;;  %2267 = vmatprep.subr.bf16.mxu1 %v2678_v33  ;;  %v2462_v34 = vld [vmem:[%s2941_s24 + $0x1c] ss:$12 sps:$4 sm:$0xff]   ;;  %v2464_v35 = vld [vmem:[%s2941_s24 + $0x18] ss:$12 sps:$4 sm:$0xff]   ;;  %v2465_v36 = vld [vmem:[%s2941_s24 + $0x34] ss:$12 sps:$4 sm:$0xff]  }
 0x1b3   : > { %959 = vmatprep.subr.bf16.mxu0 %v2459_v30  ;;  %v2467_v37 = vld [vmem:[%s2941_s24 + $0x30] ss:$12 sps:$4 sm:$0xff]   ;;  %v2468_v38 = vld [vmem:[%s2941_s24 + $0x4c] ss:$12 sps:$4 sm:$0xff]   ;;  %v2470_v39 = vld [vmem:[%s2941_s24 + $0x48] ss:$12 sps:$4 sm:$0xff]  }
 0x1b4   : > { %960 = vmatpush1.bf16.msra.mxu0 %v2461_v31  ;;  %v2471_v40 = vld [vmem:[%s2941_s24 + $0x64] ss:$12 sps:$4 sm:$0xff]   ;;  %v2483_v41 = vld [vmem:[%s2941_s24 + $0x8] ss:$12 sps:$4 sm:$0xff]   ;;  %v2484_v42 = vld [vmem:[%s2941_s24 + $0x20] ss:$12 sps:$4 sm:$0xff]  }
 0x1b5   : > { %961 = vmatprep.subr.bf16.mxu0 %v2462_v34  ;;  %2268 = vmatpush3.bf16.msra.mxu1 %v2483_v41  ;;  %v2473_v43 = vld [vmem:[%s2941_s24 + $0x60] ss:$12 sps:$4 sm:$0xff]   ;;  %v2474_v44 = vld [vmem:[%s2941_s24 + $0x7c] ss:$12 sps:$4 sm:$0xff]   ;;  %v2485_v45 = vld [vmem:[%s2941_s24 + $0x38] ss:$12 sps:$4 sm:$0xff]  }
 0x1b6   : > { %2269 = vmatprep.subr.bf16.mxu1 %v2678_v33  ;;  %v2476_v46 = vld [vmem:[%s2941_s24 + $0x78] ss:$12 sps:$4 sm:$0xff]   ;;  %v2477_v47 = vld [vmem:[%s2941_s24 + $0x94] ss:$12 sps:$4 sm:$0xff]   ;;  %v2486_v48 = vld [vmem:[%s2941_s24 + $0x50] ss:$12 sps:$4 sm:$0xff]  }
 0x1b7   : > { %v2479_v49 = vld [vmem:[%s2941_s24 + $0x90] ss:$12 sps:$4 sm:$0xff]   ;;  %v2480_v50 = vld [vmem:[%s2941_s24 + $0xac] ss:$12 sps:$4 sm:$0xff]   ;;  %v2487_v51 = vld [vmem:[%s2941_s24 + $0x68] ss:$12 sps:$4 sm:$0xff]  }
 0x1b8   : > { %962 = vmatpush1.bf16.msra.mxu0 %v2464_v35  ;;  %v2482_v52 = vld [vmem:[%s2941_s24 + $0xa8] ss:$12 sps:$4 sm:$0xff]   ;;  %v3018_v53 = vld [vmem:[#allocation7] sm:$0xff]  ;;  %v2490_v58 = vld [vmem:[%s2941_s24 + $0xb0] ss:$12 sps:$4 sm:$0xff]   ;;  %vm2679_vm1 = vmmov 0  }
 0x1b9   : > { %963 = vmatprep.subr.bf16.mxu0 %v2465_v36  ;;  %2270 = vmatpush3.bf16.msra.mxu1 %v2484_v42  ;;  %v3020_v54 = vld [vmem:[#allocation7 + $0x8] sm:$0xff]  ;;  %v2489_v57 = vld [vmem:[%s2941_s24 + $0x98] ss:$12 sps:$4 sm:$0xff]   ;;  %v817_v59 = vshrl.u32 %v724_v0, 7  ;;  %v814_v61 = vld [vmem:[%s2950_s12] sm:$0x7] }
 0x1ba   : > { %2271 = vmatprep.subr.bf16.mxu1 %v2678_v33  ;;  %v2488_v55 = vld [vmem:[%s2941_s24 + $0x80] ss:$12 sps:$4 sm:$0xff]   ;;  %v781_v56 = vpack.c.bf16 %v3020_v54, %v3018_v53  ;;  %2283 = vmatprep.mubr.msk.bf16.mxu1 %vm2679_vm1, %v2678_v33  ;;  %vm1047_vm2 = vcmp.lt.s32.totalorder %v2927_v1, 16  ;;  %vm1163_vm4 = vcmp.ge.s32.totalorder %v2927_v1, 16  ;;  %vm1117_vm7 = vcmask 1043456   ;;  %s3327_s29 = sld [smem:[#allocation17_spill]] }
 0x1bb   : > { %v822_v60 = vsub.s32 1, %v817_v59  ;;  %v818_v2 = vsub.s32 0, %v817_v59  ;;  %vm2158_vm3 = vmpackc.low %vm1047_vm2, %vm1047_vm2  ;;  %v826_v15 = vsub.s32 2, %v817_v59  ;;  %vm1101_vm8 = vcmask 64512   ;;  %s3329_s4 = sld [smem:[#allocation15_spill]]  ;;  %s2680_s30 = smov [#allocation7]  }
 0x1bc   : > { %964 = vmatpush1.bf16.msra.mxu0 %v2467_v37  ;;  %vm3061_vm5 = vmand %vm1163_vm4, %vm726_vm0  ;;  %v2206_v1 = vld [vmem:[%s719_s17] ss:$0 sm:$0xff]  ;;  %p2413_p3 = scmp.eq.s32.totalorder %s2787_s25, 1 }
 0x1bd   : > { %965 = vmatprep.subr.bf16.mxu0 %v2468_v38  ;;  %2272 = vmatpush3.bf16.msra.mxu1 %v2485_v45  ;;  %v823_v63 = vrot.slane %v814_v61, %v822_v60  ;;  %v819_v8 = vrot.slane %v814_v61, %v818_v2  ;;  %vm2163_vm6 = vmpackc.low %vm3061_vm5, %vm3061_vm5  ;;  %v827_v16 = vrot.slane %v814_v61, %v826_v15 }
 0x1be   : > { %2273 = vmatprep.subr.bf16.mxu1 %v2678_v33 }
 0x1c0   : > { %966 = vmatpush1.bf16.msra.mxu0 %v2470_v39  ;;  %v2161_v28 = vld [vmem:[%s3327_s29] ss:$0 sm:$0xff]  ;;  %v2171_v34 = vld [vmem:[%s3327_s29 + $0x1] ss:$0 sm:$0xff] }
 0x1c1   : > { %967 = vmatprep.subr.bf16.mxu0 %v2471_v40  ;;  %2274 = vmatpush3.bf16.msra.mxu1 %v2486_v48 }
 0x1c2   : > { %2275 = vmatprep.subr.bf16.mxu1 %v2678_v33 }
 0x1c4   : > { %968 = vmatpush1.bf16.msra.mxu0 %v2473_v43 }
 0x1c5   : > { %969 = vmatprep.subr.bf16.mxu0 %v2474_v44  ;;  %2276 = vmatpush3.bf16.msra.mxu1 %v2487_v51 }
 0x1c6   : > { %2277 = vmatprep.subr.bf16.mxu1 %v2678_v33 }
 0x1c8   : > { %970 = vmatpush1.bf16.msra.mxu0 %v2476_v46 }
 0x1c9   : > { %971 = vmatprep.subr.bf16.mxu0 %v2477_v47  ;;  %2278 = vmatpush3.bf16.msra.mxu1 %v2488_v55 }
 0x1ca   : > { %2279 = vmatprep.subr.bf16.mxu1 %v2678_v33 }
 0x1cc   : > { %972 = vmatpush1.bf16.msra.mxu0 %v2479_v49 }
 0x1cd   : > { %973 = vmatprep.subr.bf16.mxu0 %v2480_v50  ;;  %2280 = vmatpush3.bf16.msra.mxu1 %v2489_v57 }
 0x1ce   : > { %2281 = vmatprep.subr.bf16.mxu1 %v2678_v33 }
 0x1d0   : > { %974 = vmatpush1.bf16.msra.mxu0 %v2482_v52 }
 0x1d1   : > { %2311 = vmatprep.subr.bf16.mxu0 %v2678_v33  ;;  %2282 = vmatpush3.bf16.msra.mxu1 %v2490_v58 }
 0x1d2   : > { %2287 = vmatprep.subr.bf16.mxu1 %v2678_v33 }
 0x1d3   : > { %992 = vmatmul.mubr.bf16.vlgmr.msra.gmra.mrb[0].mxu0 %v781_v56 }
 0x1d4   : > { %2313 = vmatprep.mubr.msk.bf16.mxu0 %vm2679_vm1, %v2678_v33  ;;  %2284 = vmatmul.mubr.bf16.vlgmr.msra.gmra.mrb[0].mxu1 %v781_v56 }
 0x1d5   : > { %2289 = vmatprep.mubr.msk.bf16.mxu1 %vm2679_vm1, %v2678_v33 }
 0x2a6   : > { %v993_v62 = vpop.f32.mrb[0].mxu0 }
 0x2a7   : > { %v995_v3 = vpop.f32.mrb[1].mxu0  ;;  %v994_v11 = vadd.f32 %v993_v62, %v819_v8  ;;  %v1036_v17 = vpop.f32.mrb[0].mxu1 }
 0x2a8   : > { %v997_v4 = vpop.f32.mrb[2].mxu0  ;;  %v996_v6 = vadd.f32 %v995_v3, %v823_v63  ;;  %v1037_v18 = vadd.f32 %v1036_v17, %v827_v16  ;;  %v2285_v19 = vpop.f32.mrb[1].mxu1 }
 0x2a9   : > { %v999_v5 = vpop.f32.mrb[3].mxu0  ;;  %v998_v0 = vadd.f32 %v997_v4, %v819_v8  ;;  %v3051_v12 = vpack.c.bf16 %v994_v11, %v994_v11  ;;  %v1039_v20 = vpop.f32.mrb[2].mxu1 }
 0x2aa   : > { %v1000_v7 = vadd.f32 %v999_v5, %v823_v63  ;;  %v1040_v21 = vadd.f32 %v1039_v20, %v827_v16  ;;  %v2286_v22 = vpop.f32.mrb[3].mxu1 }
 0x2ab   : > { %v2169_v13 = vpack.c.bf16 %v998_v0, %v998_v0 }
 0x2ac   : > { %v3041_v9 = vpack.c.bf16 %v1000_v7, %v996_v6  ;;  %v1044_v23 = vpack.c.bf16 %v1040_v21, %v1037_v18 }
 0x2ae   : > { %v1273_v10 = vrot.slane %v3041_v9, 4  ;;  %2288 = vmatpush3.bf16.xpose.msra.mxu1 %v3041_v9  ;;  %v1336_v24 = vrot.slane %v1044_v23, 4  ;;  %v1119_v25 = vsel %vm1117_vm7, %v1044_v23, 0 }
 0x2af   : > { %2293 = vmatprep.subr.bf16.mxu1 %v2678_v33 }
 0x2b0   : > { %2312 = vmatpush3.bf16.xpose.msra.mxu0 %v1273_v10  ;;  %v3077_v26 = vsel %vm1117_vm7, %v1336_v24, 0 }
 0x2b1   : > { %2323 = vmatprep.subr.bf16.mxu0 %v2678_v33 }
 0x2b5   : > { %2290 = vmatmul.mubr.msk.bf16.vlgmr.msra.gmra.mrb[4].mxu1 %vm2158_vm3, %v3051_v12 }
 0x2b6   : > { %2295 = vmatprep.mubr.msk.bf16.mxu1 %vm2679_vm1, %v2678_v33  ;;  %2294 = vmatpush3.bf16.msra.mxu1 %v1119_v25 }
 0x2b7   : > { %2314 = vmatmul.mubr.msk.bf16.vlgmr.msra.gmra.mrb[4].mxu0 %vm2158_vm3, %v2169_v13  ;;  %2299 = vmatprep.subr.bf16.mxu1 %v2678_v33 }
 0x2b8   : > { %2324 = vmatpush3.bf16.xpose.msra.mxu0 %v1273_v10  ;;  %2325 = vmatprep.mubr.msk.bf16.mxu0 %vm2679_vm1, %v2678_v33 }
 0x2b9   : > { %2335 = vmatprep.subr.bf16.mxu0 %v2678_v33 }
 0x2bf   : > { %2326 = vmatmul.mubr.msk.bf16.vlgmr.msra.gmra.mrb[8].mxu0 %vm2163_vm6, %v2169_v13 }
 0x2c0   : > { %2351 = vmatprep.mubr.msk.bf16.mxu0 %vm2679_vm1, %v2678_v33 }
 0x388   : > { %v1087_v27 = vpop.f32.mrb[4].mxu1 }
 0x389   : > { %v1093_v29 = vmul.f32 0.25, %v1087_v27  ;;  %v2291_v30 = vpop.f32.mrb[5].mxu1  ;;  %v2491_v27 = vld [vmem:[%s2936_s21] sm:$0xff]  }
 0x38a   : > { %v1090_v31 = vpop.f32.mrb[6].mxu1  ;;  %v1309_v32 = vpop.f32.mrb[4].mxu0  ;;  %2336 = vmatpush3.bf16.msra.mxu0 %v2491_v27  ;;  %v2503_v27 = vld [vmem:[%s2910_s27 + $0x20] sm:$0xff]  }
 0x38b   : > { %v1315_v35 = vmul.f32 0.25, %v1309_v32  ;;  %v2292_v36 = vpop.f32.mrb[7].mxu1  ;;  %v2315_v37 = vpop.f32.mrb[5].mxu0  ;;  %v1100_v38 = vadd.f32 %v2161_v28, %v1093_v29  ;;  %2337 = vmatprep.subr.bf16.mxu0 %v2678_v33  ;;  %v2493_v29 = vld [vmem:[%s2936_s21 + $0x10] sm:$0xff]  }
 0x38c   : > { %v1312_v39 = vpop.f32.mrb[6].mxu0 }
 0x38d   : > { %v2316_v40 = vpop.f32.mrb[7].mxu0  ;;  %v1102_v41 = vsel %vm1101_vm8, %v1100_v38, -inf  ;;  %v1322_v42 = vadd.f32 %v2171_v34, %v1315_v35 }
 0x38e   : > { %1103 = vmax.xlane.f32.xlu0 %v1102_v41 }
 0x38f   : > { %v1323_v10 = vsel %vm1101_vm8, %v1322_v42, -inf }
 0x392   : > { %v1421_v43 = vpop.f32.mrb[8].mxu0 }
 0x393   : > { %v2327_v44 = vpop.f32.mrb[9].mxu0  ;;  %v1427_v50 = vmul.f32 0.25, %v1421_v43  ;;  %v2494_v43 = vld [vmem:[%s2936_s21 + $0x18] sm:$0xff]  }
 0x394   : > { %v1424_v45 = vpop.f32.mrb[10].mxu0  ;;  %v2495_v44 = vld [vmem:[%s2936_s21 + $0x20] sm:$0xff]  }
 0x395   : > { %v2328_v46 = vpop.f32.mrb[11].mxu0  ;;  %v1428_v55 = vadd.f32 %v2171_v34, %v1427_v50  ;;  %v2497_v45 = vld [vmem:[%s2936_s21 + $0x30] sm:$0xff]  }
 0x396   : > { %v2498_v46 = vld [vmem:[%s2936_s21 + $0x38] sm:$0xff]  }
 0x397   : > { %v1429_v56 = vsel %vm1101_vm8, %v1428_v55, -inf }
 0x41b   : > { %v1104_v47 = vpop.xlane.xlu0 %1103 }
 0x41c   : > { %v1105_v48 = vsub.f32 %v1100_v38, %v1104_v47 }
 0x41e   : > { %v1106_v49 = vmul.f32 1.442695, %v1105_v48 }
 0x420   : > { %2515 = vpow2.f32 %v1106_v49 }
 0x42a   : > { %v2516_v51 = vpop.eup %2515 }
 0x42b   : > { %v1108_v52 = vsel %vm1101_vm8, %v2516_v51, 0.0 }
 0x42c   : > { %1109 = vadd.xlane.f32.xlu0 %v1108_v52 }
 0x430   : > { %1430 = vmax.xlane.f32.xlu0 %v1429_v56 }
 0x4b9   : > { %v1110_v57 = vpop.xlane.xlu0 %1109 }
 0x4ba   : > { %2517 = vrcp.f32 %v1110_v57 }
 0x4bd   : > { %v1431_v11 = vpop.xlane.xlu0 %1430 }
 0x4be   : > { %v1432_v0 = vsub.f32 %v1428_v55, %v1431_v11 }
 0x4c0   : > { %v1433_v15 = vmul.f32 1.442695, %v1432_v0 }
 0x4c4   : > { %v2518_v58 = vpop.eup %2517 }
 0x4c5   : > { %v1112_v59 = vmul.f32 %v2518_v58, %v2516_v51 }
 0x4c7   : > { %v1113_v60 = vpack.c.bf16 %v1112_v59, %v1112_v59 }
 0x4c9   : > { %2296 = vmatmul.mubr.msk.bf16.vlgmr.msra.gmra.mrb[8].mxu1 %vm1101_vm8, %v1113_v60 }
 0x4ca   : > { %2300 = vmatpush3.bf16.xpose.msra.mxu1 %v3041_v9  ;;  %2301 = vmatprep.mubr.msk.bf16.mxu1 %vm2679_vm1, %v2678_v33 }
 0x4cb   : > { %2305 = vmatprep.subr.bf16.mxu1 %v2678_v33 }
 0x4d1   : > { %2302 = vmatmul.mubr.msk.bf16.vlgmr.msra.gmra.mrb[12].mxu1 %vm2163_vm6, %v3051_v12 }
 0x4d2   : > { %2306 = vmatpush3.bf16.msra.mxu1 %v1119_v25  ;;  %2307 = vmatprep.mubr.msk.bf16.mxu1 %vm2679_vm1, %v2678_v33 }
 0x4d3   : > { %2317 = vmatprep.subr.bf16.mxu1 %v2678_v33 }
 0x59c   : > { %v3102_v61 = vpop.f32.mrb[8].mxu1 }
 0x59d   : > { %v2297_v62 = vpop.f32.mrb[9].mxu1  ;;  %v1161_v48 = vsel %vm1047_vm2, %v3102_v61, 0.0 }
 0x59e   : > { %v1158_v63 = vpop.f32.mrb[10].mxu1 }
 0x59f   : > { %v2298_v2 = vpop.f32.mrb[11].mxu1 }
 0x5a4   : > { %v1203_v3 = vpop.f32.mrb[12].mxu1 }
 0x5a5   : > { %v1209_v4 = vmul.f32 0.25, %v1203_v3  ;;  %v2303_v5 = vpop.f32.mrb[13].mxu1 }
 0x5a6   : > { %v1206_v6 = vpop.f32.mrb[14].mxu1 }
 0x5a7   : > { %v2304_v7 = vpop.f32.mrb[15].mxu1  ;;  %v1210_v8 = vadd.f32 %v2161_v28, %v1209_v4  ;;  %v2492_v28 = vld [vmem:[%s2936_s21 + $0x8] sm:$0xff]   ;;  %v2177_v6 = vld [vmem:[%s3328_s10] ss:$0 sm:$0xff] }
 0x5a8   : > { %2338 = vmatpush3.bf16.msra.mxu0 %v2492_v28  ;;  %v2504_v28 = vld [vmem:[%s2910_s27 + $0x28] sm:$0xff]  }
 0x5a9   : > { %v1211_v9 = vsel %vm1101_vm8, %v1210_v8, -inf  ;;  %2339 = vmatprep.subr.bf16.mxu0 %v2678_v33 }
 0x5aa   : > { %1212 = vmax.xlane.f32.xlu1 %v1211_v9 }
 0x5ac   : > { %2340 = vmatpush3.bf16.msra.mxu0 %v2493_v29  ;;  %v2505_v29 = vld [vmem:[%s2910_s27 + $0x30] sm:$0xff]  }
 0x5ad   : > { %2341 = vmatprep.subr.bf16.mxu0 %v2678_v33 }
 0x5ae   : > { %1324 = vmax.xlane.f32.xlu1 %v1323_v10 }
 0x5b0   : > { %2342 = vmatpush3.bf16.msra.mxu0 %v2494_v43 }
 0x5b1   : > { %2343 = vmatprep.subr.bf16.mxu0 %v2678_v33 }
 0x5b4   : > { %2344 = vmatpush3.bf16.msra.mxu0 %v2495_v44  ;;  %v2187_v44 = vld [vmem:[%s710_s6] ss:$0 sm:$0xff] }
 0x5b5   : > { %2345 = vmatprep.subr.bf16.mxu0 %v2678_v33 }
 0x637   : > { %v1213_v12 = vpop.xlane.xlu1 %1212 }
 0x638   : > { %v1214_v13 = vsub.f32 %v1210_v8, %v1213_v12 }
 0x63a   : > { %v1215_v16 = vmul.f32 1.442695, %v1214_v13  ;;  %v2499_v13 = vld [vmem:[%s2910_s27] sm:$0xff]  }
 0x63b   : > { %v1325_v17 = vpop.xlane.xlu1 %1324 }
 0x63c   : > { %2519 = vpow2.f32 %v1215_v16  ;;  %v1326_v18 = vsub.f32 %v1322_v42, %v1325_v17 }
 0x63d   : > { %2521 = vpow2.f32 %v1433_v15  ;;  %v2500_v15 = vld [vmem:[%s2910_s27 + $0x8] sm:$0xff]  }
 0x63e   : > { %v1327_v19 = vmul.f32 1.442695, %v1326_v18 }
 0x640   : > { %2523 = vpow2.f32 %v1327_v19 }
 0x646   : > { %v2520_v20 = vpop.eup %2519 }
 0x647   : > { %v1217_v21 = vsel %vm1101_vm8, %v2520_v20, 0.0  ;;  %v2522_v22 = vpop.eup %2521 }
 0x648   : > { %1218 = vadd.xlane.f32.xlu1 %v1217_v21  ;;  %v1435_v24 = vsel %vm1101_vm8, %v2522_v22, 0.0 }
 0x64a   : > { %v2524_v23 = vpop.eup %2523 }
 0x64b   : > { %v1329_v25 = vsel %vm1101_vm8, %v2524_v23, 0.0 }
 0x64c   : > { %1436 = vadd.xlane.f32.xlu1 %v1435_v24  ;;  %1330 = vadd.xlane.f32.xlu0 %v1329_v25  ;;  %v2501_v24 = vld [vmem:[%s2910_s27 + $0x10] sm:$0xff]   ;;  %v2502_v25 = vld [vmem:[%s2910_s27 + $0x18] sm:$0xff]  }
 0x6d5   : > { %v1219_v30 = vpop.xlane.xlu1 %1218 }
 0x6d6   : > { %2525 = vrcp.f32 %v1219_v30  ;;  %v2506_v30 = vld [vmem:[%s2910_s27 + $0x38] sm:$0xff]  }
 0x6d9   : > { %v1331_v31 = vpop.xlane.xlu0 %1330  ;;  %v1437_v32 = vpop.xlane.xlu1 %1436 }
 0x6da   : > { %2527 = vrcp.f32 %v1331_v31 }
 0x6db   : > { %2529 = vrcp.f32 %v1437_v32 }
 0x6e0   : > { %v2526_v34 = vpop.eup %2525 }
 0x6e1   : > { %v1221_v35 = vmul.f32 %v2526_v34, %v2520_v20 }
 0x6e3   : > { %v1222_v36 = vpack.c.bf16 %v1221_v35, %v1221_v35 }
 0x6e4   : > { %v2528_v37 = vpop.eup %2527 }
 0x6e5   : > { %2308 = vmatmul.mubr.msk.bf16.vlgmr.msra.gmra.mrb[16].mxu1 %vm1101_vm8, %v1222_v36  ;;  %v1333_v38 = vmul.f32 %v2528_v37, %v2524_v23  ;;  %v2530_v40 = vpop.eup %2529 }
 0x6e6   : > { %2318 = vmatpush3.bf16.msra.mxu1 %v3077_v26  ;;  %2319 = vmatprep.mubr.msk.bf16.mxu1 %vm2679_vm1, %v2678_v33  ;;  %v1439_v41 = vmul.f32 %v2530_v40, %v2522_v22 }
 0x6e7   : > { %2329 = vmatprep.subr.bf16.mxu1 %v2678_v33  ;;  %v1334_v39 = vpack.c.bf16 %v1333_v38, %v1333_v38 }
 0x6e8   : > { %v1440_v42 = vpack.c.bf16 %v1439_v41, %v1439_v41 }
 0x6ed   : > { %2320 = vmatmul.mubr.msk.bf16.vlgmr.msra.gmra.mrb[20].mxu1 %vm1101_vm8, %v1334_v39  ;;  %v2186_v39 = vld [vmem:[%s707_s18] ss:$0 sm:$0xff] }
 0x6ee   : > { %2330 = vmatpush3.bf16.msra.mxu1 %v3077_v26  ;;  %2331 = vmatprep.mubr.msk.bf16.mxu1 %vm2679_vm1, %v2678_v33  ;;  %v2496_v26 = vld [vmem:[%s2936_s21 + $0x28] sm:$0xff]   ;;  %s1941_s21 = sshll.u32 %s2680_s30, 4  ;;  %s1942_s21 = int_to_ptr.vmem [resolvable:$true] %s1941_s21 }
 0x6ef   : > { %2355 = vmatprep.subr.bf16.mxu1 %v2678_v33  ;;  %2346 = vmatpush3.bf16.msra.mxu0 %v2496_v26  ;;  %s2603_s17 = scalar_lea.vmem %s1942_s21, 256  ;;  %p2610_p9 = scmp.lt.s32.totalorder %s1942_s21, %s1942_s21 }
 0x6f0   : > { %2347 = vmatprep.subr.bf16.mxu0 %v2678_v33  ;;  %p2604_p6 = scmp.ne.s32.totalorder %s1942_s21, %s2603_s17  ;;  %p2611_p13 = scmp.lt.s32.totalorder %s2603_s17, %s2603_s17 }
 0x6f2   : > { %p2605_p1 = pnand %p2604_p6, %p2413_p3  ;;  %p2612_p4 = por %p2611_p13, %p2610_p9 }
 0x6f3   : > { %2348 = vmatpush3.bf16.msra.mxu0 %v2497_v45 }
 0x6f4   : > { %2349 = vmatprep.subr.bf16.mxu0 %v2678_v33  ;;  %p2606_p2 = pneg %p2605_p1 }
 0x6f5   : > { %2332 = vmatmul.mubr.msk.bf16.vlgmr.msra.gmra.mrb[24].mxu1 %vm1101_vm8, %v1440_v42 }
 0x6f6   : > { %2371 = vmatprep.mubr.msk.bf16.mxu1 %vm2679_vm1, %v2678_v33  ;;  %2356 = vmatpush3.bf16.msra.mxu1 %v2499_v13  ;;  %p2613_p5 = pnand %p2612_p4, %p2606_p2 }
 0x6f7   : > { %2350 = vmatpush3.bf16.msra.mxu0 %v2498_v46  ;;  %2357 = vmatprep.subr.bf16.mxu1 %v2678_v33 }
 0x6f8   : > { %2375 = vmatprep.subr.bf16.mxu0 %v2678_v33 }
 0x6fa   : > { %2358 = vmatpush3.bf16.msra.mxu1 %v2500_v15 }
 0x6fb   : > { %2359 = vmatprep.subr.bf16.mxu1 %v2678_v33 }
 0x6fe   : > { %2360 = vmatpush3.bf16.msra.mxu1 %v2501_v24 }
 0x6ff   : > { %2361 = vmatprep.subr.bf16.mxu1 %v2678_v33 }
 0x702   : > { %2362 = vmatpush3.bf16.msra.mxu1 %v2502_v25 }
 0x703   : > { %2363 = vmatprep.subr.bf16.mxu1 %v2678_v33 }
 0x706   : > { %2364 = vmatpush3.bf16.msra.mxu1 %v2503_v27 }
 0x707   : > { %2365 = vmatprep.subr.bf16.mxu1 %v2678_v33 }
 0x70a   : > { %2366 = vmatpush3.bf16.msra.mxu1 %v2504_v28 }
 0x70b   : > { %2367 = vmatprep.subr.bf16.mxu1 %v2678_v33 }
 0x70e   : > { %2368 = vmatpush3.bf16.msra.mxu1 %v2505_v29 }
 0x70f   : > { %2369 = vmatprep.subr.bf16.mxu1 %v2678_v33 }
 0x712   : > { %2370 = vmatpush3.bf16.msra.mxu1 %v2506_v30 }
 0x7b8   : > { %v1260_v47 = vpop.f32.mrb[16].mxu1 }
 0x7b9   : > { %v1266_v49 = vsel %vm3061_vm5, %v1260_v47, 0.0  ;;  %v2309_v50 = vpop.f32.mrb[17].mxu1 }
 0x7ba   : > { %v1267_v51 = vadd.f32 %v1266_v49, %v1161_v48  ;;  %v1263_v52 = vpop.f32.mrb[18].mxu1  ;;  %v2507_v48 = vld [vmem:[%s3329_s4] sm:$0xff]   ;;  %v2508_v49 = vld [vmem:[%s3329_s4 + $0x8] sm:$0xff]   ;;  %v2509_v50 = vld [vmem:[%s3329_s4 + $0x10] sm:$0xff]  }
 0x7bb   : > { %v2310_v55 = vpop.f32.mrb[19].mxu1  ;;  %v2511_v52 = vld [vmem:[%s3329_s4 + $0x20] sm:$0xff]  }
 0x7bc   : > { %v2512_v55 = vld [vmem:[%s3329_s4 + $0x28] sm:$0xff]  }
 0x7c0   : > { %v1377_v56 = vpop.f32.mrb[20].mxu1 }
 0x7c1   : > { %v2321_v57 = vpop.f32.mrb[21].mxu1  ;;  %v1383_v62 = vsel %vm1047_vm2, %v1377_v56, 0.0  ;;  %v2513_v56 = vld [vmem:[%s3329_s4 + $0x30] sm:$0xff]  }
 0x7c2   : > { %v1380_v58 = vpop.f32.mrb[22].mxu1  ;;  %v2514_v57 = vld [vmem:[%s3329_s4 + $0x38] sm:$0xff]  }
 0x7c3   : > { %v2322_v59 = vpop.f32.mrb[23].mxu1  ;;  %v2188_v58 = vld [vmem:[%s713_s16] ss:$0 sm:$0xff] }
 0x7c8   : > { %v1478_v60 = vpop.f32.mrb[24].mxu1 }
 0x7c9   : > { %v1484_v63 = vsel %vm3061_vm5, %v1478_v60, 0.0  ;;  %v2333_v61 = vpop.f32.mrb[25].mxu1 }
 0x7ca   : > { %v1485_v2 = vadd.f32 %v1484_v63, %v1383_v62  ;;  %v1481_v3 = vpop.f32.mrb[26].mxu1 }
 0x7cb   : > { %v2334_v4 = vpop.f32.mrb[27].mxu1 }
 0x7cc   : > { %v1486_v5 = vpack.c.bf16 %v1485_v2, %v1267_v51  ;;  %v2510_v51 = vld [vmem:[%s3329_s4 + $0x18] sm:$0xff]  }
 0x7ce   : > { %2352 = vmatmul.mubr.bf16.vlgmr.msra.gmra.mrb[12].mxu0 %v1486_v5 }
 0x7cf   : > { %2391 = vmatprep.mubr.msk.bf16.mxu0 %vm2679_vm1, %v2678_v33  ;;  %2376 = vmatpush3.bf16.msra.mxu0 %v2507_v48 }
 0x7d0   : > { %2377 = vmatprep.subr.bf16.mxu0 %v2678_v33 }
 0x7d3   : > { %2378 = vmatpush3.bf16.msra.mxu0 %v2508_v49 }
 0x7d4   : > { %2379 = vmatprep.subr.bf16.mxu0 %v2678_v33 }
 0x7d7   : > { %2380 = vmatpush3.bf16.msra.mxu0 %v2509_v50 }
 0x7d8   : > { %2381 = vmatprep.subr.bf16.mxu0 %v2678_v33 }
 0x7db   : > { %2382 = vmatpush3.bf16.msra.mxu0 %v2510_v51 }
 0x7dc   : > { %2383 = vmatprep.subr.bf16.mxu0 %v2678_v33 }
 0x7df   : > { %2384 = vmatpush3.bf16.msra.mxu0 %v2511_v52 }
 0x7e0   : > { %2385 = vmatprep.subr.bf16.mxu0 %v2678_v33 }
 0x7e3   : > { %2386 = vmatpush3.bf16.msra.mxu0 %v2512_v55 }
 0x7e4   : > { %2387 = vmatprep.subr.bf16.mxu0 %v2678_v33 }
 0x7e7   : > { %2388 = vmatpush3.bf16.msra.mxu0 %v2513_v56 }
 0x7e8   : > { %2389 = vmatprep.subr.bf16.mxu0 %v2678_v33 }
 0x7eb   : > { %2390 = vmatpush3.bf16.msra.mxu0 %v2514_v57 }
 0x8a1   : > { %v1592_v7 = vpop.f32.mrb[12].mxu0 }
 0x8a2   : > { %v1593_v8 = vadd.f32 %v2177_v6, %v1592_v7  ;;  %v2353_v14 = vpop.f32.mrb[13].mxu0 }
 0x8a3   : > { %v1595_v9 = vpop.f32.mrb[14].mxu0 }
 0x8a4   : > { %v1596_v10 = vadd.f32 %v2177_v6, %v1595_v9  ;;  %v2354_v11 = vpop.f32.mrb[15].mxu0  ;;  %v1599_v0 = vadd.f32 %v1593_v8, %v3018_v53 }
 0x8a6   : > { %1603 = vadd.xlane.f32.xlu0 %v1599_v0  ;;  %v1600_v12 = vadd.f32 %v1596_v10, %v3020_v54 }
 0x8a8   : > { %1605 = vadd.xlane.f32.xlu1 %v1600_v12 }
 0x933   : > { %v1604_v16 = vpop.xlane.xlu0 %1603 }
 0x934   : > { %v1607_v17 = vmul.f32 0.03125, %v1604_v16 }
 0x935   : > { %v1606_v18 = vpop.xlane.xlu1 %1605 }
 0x936   : > { %v1609_v19 = vsub.f32 %v1599_v0, %v1607_v17  ;;  %v1608_v53 = vmul.f32 0.03125, %v1606_v18 }
 0x938   : > { %v1610_v20 = vsub.f32 %v1600_v12, %v1608_v53  ;;  %v1613_v54 = vsel %vm726_vm0, %v1609_v19, 0.0  ;;  %v2197_v53 = vld [vmem:[%s716_s28] ss:$0 sm:$0xff] }
 0x939   : > { %v1615_v21 = vmul.f32 %v1613_v54, %v1613_v54 }
 0x93a   : > { %v1614_v22 = vsel %vm726_vm0, %v1610_v20, 0.0 }
 0x93b   : > { %1617 = vadd.xlane.f32.xlu0 %v1615_v21  ;;  %v1616_v23 = vmul.f32 %v1614_v22, %v1614_v22 }
 0x93d   : > { %1619 = vadd.xlane.f32.xlu1 %v1616_v23 }
 0x9c8   : > { %v1618_v31 = vpop.xlane.xlu0 %1617 }
 0x9c9   : > { %v1621_v32 = vmul.f32 0.03125, %v1618_v31 }
 0x9ca   : > { %v1620_v34 = vpop.xlane.xlu1 %1619 }
 0x9cb   : > { %v1623_v35 = vadd.f32 1e-12, %v1621_v32  ;;  %v1622_v36 = vmul.f32 0.03125, %v1620_v34 }
 0x9cd   : > { %2531 = vrsqrt.f32 %v1623_v35  ;;  %v1624_v37 = vadd.f32 1e-12, %v1622_v36 }
 0x9cf   : > { %2533 = vrsqrt.f32 %v1624_v37 }
 0x9d7   : > { %v2532_v38 = vpop.eup %2531 }
 0x9d8   : > { %v1627_v40 = vmul.f32 %v2532_v38, %v1613_v54 }
 0x9d9   : > { %v2534_v41 = vpop.eup %2533 }
 0x9da   : > { %v1628_v42 = vmul.f32 %v2534_v41, %v1614_v22  ;;  %v1635_v43 = vmul.f32 %v2186_v39, %v1627_v40 }
 0x9dc   : > { %v1636_v26 = vmul.f32 %v2186_v39, %v1628_v42  ;;  %v3185_v45 = vadd.f32 %v2187_v44, %v1635_v43 }
 0x9de   : > { %v3187_v46 = vadd.f32 %v2187_v44, %v1636_v26 }
 0x9e0   : > { %v1645_v47 = vpack.c.bf16 %v3187_v46, %v3185_v45 }
 0x9e2   : > { %2372 = vmatmul.mubr.bf16.vlgmr.msra.gmra.mrb[28].mxu1 %v1645_v47  ;;  %v2207_v47 = vld [vmem:[%s722_s22] ss:$0 sm:$0xff] }
 0xab5   : > { %v1751_v59 = vpop.f32.mrb[28].mxu1 }
 0xab6   : > { %v1752_v60 = vadd.f32 %v2188_v58, %v1751_v59  ;;  %v2373_v62 = vpop.f32.mrb[29].mxu1 }
 0xab7   : > { %v1754_v63 = vpop.f32.mrb[30].mxu1 }
 0xab8   : > { %v1758_v61 = vmul.f32 %v1752_v60, %v1752_v60  ;;  %v1755_v2 = vadd.f32 %v2188_v58, %v1754_v63  ;;  %v2374_v3 = vpop.f32.mrb[31].mxu1 }
 0xaba   : > { %v1760_v4 = vmul.f32 %v1758_v61, %v1752_v60  ;;  %v1759_v5 = vmul.f32 %v1755_v2, %v1755_v2 }
 0xabc   : > { %v1762_v6 = vmul.f32 0.044715, %v1760_v4  ;;  %v1761_v7 = vmul.f32 %v1759_v5, %v1755_v2 }
 0xabe   : > { %v1764_v8 = vadd.f32 %v1762_v6, %v1752_v60  ;;  %v1763_v33 = vmul.f32 0.044715, %v1761_v7 }
 0xac0   : > { %v1766_v14 = vmul.f32 0.7978846, %v1764_v8  ;;  %v1765_v9 = vadd.f32 %v1763_v33, %v1755_v2 }
 0xac2   : > { %2535 = vtanh.f32 %v1766_v14  ;;  %v1767_v10 = vmul.f32 0.7978846, %v1765_v9 }
 0xac4   : > { %2537 = vtanh.f32 %v1767_v10 }
 0xacc   : > { %v2536_v11 = vpop.eup %2535 }
 0xacd   : > { %v1770_v0 = vadd.f32 1.0, %v2536_v11 }
 0xace   : > { %v2538_v12 = vpop.eup %2537 }
 0xacf   : > { %v1772_v13 = vmul.f32 0.5, %v1770_v0  ;;  %v1771_v15 = vadd.f32 1.0, %v2538_v12 }
 0xad1   : > { %v1773_v16 = vmul.f32 0.5, %v1771_v15  ;;  %v1774_v17 = vmul.f32 %v1772_v13, %v1752_v60 }
 0xad3   : > { %v1775_v18 = vmul.f32 %v1773_v16, %v1755_v2 }
 0xad5   : > { %v1776_v19 = vpack.c.bf16 %v1775_v18, %v1774_v17 }
 0xad7   : > { %2392 = vmatmul.mubr.bf16.vlgmr.msra.gmra.mrb[16].mxu0 %v1776_v19 }
 0xbaa   : > { %v1882_v20 = vpop.f32.mrb[16].mxu0 }
 0xbab   : > { %v1883_v54 = vadd.f32 %v2197_v53, %v1882_v20  ;;  %v2393_v21 = vpop.f32.mrb[17].mxu0 }
 0xbac   : > { %v1885_v22 = vpop.f32.mrb[18].mxu0 }
 0xbad   : > { %v1886_v23 = vadd.f32 %v2197_v53, %v1885_v22  ;;  %v2394_v24 = vpop.f32.mrb[19].mxu0  ;;  %v1889_v25 = vadd.f32 %v1883_v54, %v3185_v45 }
 0xbaf   : > { %1893 = vadd.xlane.f32.xlu0 %v1889_v25  ;;  %v1890_v27 = vadd.f32 %v1886_v23, %v3187_v46 }
 0xbb1   : > { %1895 = vadd.xlane.f32.xlu1 %v1890_v27 }
 0xc3c   : > { %v1894_v28 = vpop.xlane.xlu0 %1893 }
 0xc3d   : > { %v1897_v29 = vmul.f32 0.03125, %v1894_v28 }
 0xc3e   : > { %v1896_v30 = vpop.xlane.xlu1 %1895 }
 0xc3f   : > { %v1899_v31 = vsub.f32 %v1889_v25, %v1897_v29  ;;  %v1898_v32 = vmul.f32 0.03125, %v1896_v30 }
 0xc41   : > { %v1900_v34 = vsub.f32 %v1890_v27, %v1898_v32  ;;  %v1901_v35 = vsel %vm726_vm0, %v1899_v31, 0.0 }
 0xc42   : > { %v1903_v36 = vmul.f32 %v1901_v35, %v1901_v35 }
 0xc43   : > { %v1902_v37 = vsel %vm726_vm0, %v1900_v34, 0.0 }
 0xc44   : > { %1905 = vadd.xlane.f32.xlu0 %v1903_v36  ;;  %v1904_v38 = vmul.f32 %v1902_v37, %v1902_v37 }
 0xc46   : > { %1907 = vadd.xlane.f32.xlu1 %v1904_v38 }
 0xcd1   : > { %v1906_v39 = vpop.xlane.xlu0 %1905 }
 0xcd2   : > { %v1909_v40 = vmul.f32 0.03125, %v1906_v39 }
 0xcd3   : > { %v1908_v41 = vpop.xlane.xlu1 %1907 }
 0xcd4   : > { %v1911_v42 = vadd.f32 1e-12, %v1909_v40  ;;  %v1910_v43 = vmul.f32 0.03125, %v1908_v41 }
 0xcd6   : > { %2539 = vrsqrt.f32 %v1911_v42  ;;  %v1912_v44 = vadd.f32 1e-12, %v1910_v43 }
 0xcd8   : > { %2541 = vrsqrt.f32 %v1912_v44 }
 0xce0   : > { %v2540_v26 = vpop.eup %2539 }
 0xce1   : > { %v1915_v45 = vmul.f32 %v2540_v26, %v1901_v35 }
 0xce2   : > { %v2542_v46 = vpop.eup %2541 }
 0xce3   : > { %v1916_v48 = vmul.f32 %v2542_v46, %v1902_v37  ;;  %v1923_v49 = vmul.f32 %v2206_v1, %v1915_v45 }
 0xce5   : > { %v1924_v50 = vmul.f32 %v2206_v1, %v1916_v48  ;;  %v1931_v51 = vadd.f32 %v2207_v47, %v1923_v49 }
 0xce7   : > { %v1932_v52 = vadd.f32 %v2207_v47, %v1924_v50  ;;  %1933 = vst [vmem:[#allocation7] sm:$0xff] %v1931_v51 }
 0xce9   : > { %1934 = vst [vmem:[#allocation7 + $0x8] sm:$0xff] %v1932_v52 }
 0xcea   : > { %2616 = shalt.err (!%p2613_p5)
}
 0xceb   : > { %s3330_s1 = sld [smem:[#allocation24_spill]] }
 0xcf1   : > { %s2617_s10 = scalar_lea.hbm %s3330_s1, 256 }
 0xcf2   : > { %p2618_p10 = scmp.ne.s32.totalorder %s3330_s1, %s2617_s10  ;;  %p2623_p7 = scmp.lt.u32.totalorder %s2617_s10, %s3330_s1 }
 0xcf4   : > { %p2619_p12 = pnand %p2618_p10, %p2413_p3 }
 0xcf6   : > { %p2620_p0 = pneg %p2619_p12 }
 0xcf8   : > { %p2625_p8 = pnand %p2623_p7, %p2620_p0 }
 0xcfa   : > { %2628 = shalt.err (!%p2625_p8)
}
 0xcfb   : > { %s2681_s23 = smov 128   ;;  %s2682_s6 = smov 8  }
 0xcfc   : > { %2402 = dma.vmem_to_hbm [thread:$0]  (%p2413_p3), %s1942_s21, 256, %s3330_s1, [#allocation4], %s2681_s23, %s2681_s23, %s2682_s6  }
 0xcfd   : > { %2654 = dma.done.wait (%p2413_p3), [#allocation4], 256  }
 0xcfe   : > { %2656 = vsyncadd (%p2413_p3), [#allocation4], 4294967040 }
 0xcff PF: > { %s3331_s24 = sld [smem:[#allocation13_spill]]  ;;  %s3332_s21 = sld [smem:[#allocation11_spill]] }
 0xd00   : > { %s3333_s22 = sld [smem:[#allocation12_spill]]  ;;  %s3334_s23 = sld [smem:[#allocation14_spill]] }
 0xd05   : > { %p30_p11 = scmp.ge.s32.totalorder %s3331_s24, 4  }
 0xd07   :  { %32 = sbr.rel (!%p30_p11) target bundleno = 16 (0x10), region = 169 }
 0xd0e   :  { %1957 = vsyncpa [#allocation3], 1 }
 0xd0f   :  { %1959 = vsyncpa [#allocation3 + $0x1], 1 }
 0xd10   :  { %1960 = vsyncpa [#allocation6], 1 }
 0xd11   :  { %1962 = vsyncpa [#allocation6 + $0x1], 1 }
 0xd12   :  { %1963 = vsyncpa [#allocation4], 1 }
 0xd13   :  { %1965 = vsyncpa [#allocation4 + $0x1], 1 }

</bundles_post_ra>
